<compile_context>
chip_gen: v7x
topology: tpu7x:2x2x1
jax: 0.10.0
libtpu: 0.0.40
codegen_flags: <defaults>
</compile_context>

<pallas_src>
import functools

import jax
import jax.numpy as jnp
from jax import lax
from jax.experimental import pallas as pl
from jax.experimental.pallas import tpu as pltpu


def _round_up(x: int, m: int) -> int:
    return ((x + m - 1) // m) * m


# ----------------------------------------------------------------------------
# Fused kernel: encoder matmul -> VQ -> decoder matmul, one N-tile per grid step
# ----------------------------------------------------------------------------
def _vqvae_fused_kernel(
    patches_ref,   # (T, P_pad)  f32   streamed per tile
    enc_w_ref,     # (P_pad, C_pad)    VMEM-resident (constant index_map)
    enc_b_ref,     # (1, C_pad)
    cb_ref,        # (K_pad, C_pad)
    cb_sq_ref,     # (1, K_pad)        precomputed ||e_k||^2 (resident)
    dec_w_ref,     # (C_pad, P_pad)
    dec_b_ref,     # (1, P_pad)
    recon_ref,     # (T, P_pad)  f32   streamed out per tile
    idx_ref,       # (1, 1, T)   int32 per-tile (lane-dense)
    loss_ref,      # (1, 1, 1)   f32   per-tile sum of squared diffs
    freq_ref,      # (1, 1, K_pad) f32 per-tile codebook usage histogram
    *,
    n_valid: int,  # number of real rows (rest of N_pad is zero padding)
    k_real: int,   # number of real codebook entries (rest of K_pad is padding)
    tile_n: int,
):
    i = pl.program_id(0)
    k_pad = cb_ref.shape[0]

    x = patches_ref[...]                                        # (T, P_pad)

    # ---- encoder stand-in: strided conv as patch matmul (MXU) ----
    z_e = (
        jnp.dot(x, enc_w_ref[...], preferred_element_type=jnp.float32)
        + enc_b_ref[...]
    )                                                           # (T, C_pad)
    cb = cb_ref[...]                                            # (K_pad, C_pad)

    # ---- squared distances ||z||^2 + ||e||^2 - 2 z.e (MXU cross term) ----
    z_sq = jnp.sum(z_e * z_e, axis=1, keepdims=True)            # (T, 1)
    cross = lax.dot_general(                                    # (T, K_pad)
        z_e, cb, (((1,), (1,)), ((), ())),
        preferred_element_type=jnp.float32)
    dist2 = z_sq + cb_sq_ref[...] - 2.0 * cross                 # (T, K_pad)

    col_ids = lax.broadcasted_iota(jnp.int32, dist2.shape, 1)   # (T, K_pad)
    if k_real != k_pad:
        # padded codebook rows must never win the argmin
        dist2 = jnp.where(col_ids < k_real, dist2, jnp.inf)

    # ---- argmin over codebook, first-index tie-break (matches torch.min) ----
    min_d = jnp.min(dist2, axis=1, keepdims=True)               # (T, 1)
    idx = jnp.min(jnp.where(dist2 <= min_d, col_ids, k_pad),
                  axis=1, keepdims=True)                        # (T, 1) int32

    # rows beyond the real N (zero padding of the last tile) get a sentinel so
    # they do not pollute the histogram / loss
    if n_valid % tile_n != 0:
        row_ids = lax.broadcasted_iota(jnp.int32, idx.shape, 0) + i * tile_n
        row_ok = row_ids < n_valid                              # (T, 1) bool
        idx = jnp.where(row_ok, idx, k_pad)
    else:
        row_ok = None

    onehot = (col_ids == idx).astype(jnp.float32)               # (T, K_pad)

    # ---- embedding lookup as one-hot matmul (MXU-friendly gather) ----
    z_q = jnp.dot(onehot, cb, preferred_element_type=jnp.float32)   # (T, C_pad)

    # ---- commitment loss partial: sum over valid rows of ||z_e - z_q||^2 ----
    # min_d IS the squared distance to the selected code, so no extra
    # (T, C_pad) diff/square/reduce is needed.  (0.75 * mse(z_e.detach(), z_q)
    # + mse(z_e, z_q.detach()) == 1.75 * mse in value; scaling/normalization is
    # applied once in the wrapper.)
    sq = jnp.maximum(min_d, 0.0)                                 # clamp fp slop
    if row_ok is not None:
        sq = jnp.where(row_ok, sq, 0.0)
    loss_ref[...] = jnp.sum(sq).reshape(1, 1, 1)

    # ---- codebook usage histogram partial (codebook_freq[idx] += 1) ----
    freq_ref[...] = jnp.sum(onehot, axis=0, keepdims=True).reshape(1, 1, k_pad)

    # ---- lane-dense encoding indices: (1,K) x (T,K)^T -> (1,T) on the MXU ----
    # avoids a (T,1)->(1,T) sublane->lane relayout; exact for K < 2^24 in f32.
    k_row = lax.broadcasted_iota(jnp.int32, (1, k_pad), 1).astype(jnp.float32)
    idx_row = lax.dot_general(k_row, onehot, (((1,), (1,)), ((), ())),
                              preferred_element_type=jnp.float32)   # (1, T)
    idx_ref[...] = idx_row.astype(jnp.int32).reshape(1, 1, tile_n)

    # ---- decoder stand-in (straight-through z_e + (z_q - z_e).detach() is a
    #      value-identity, so z_q is consumed directly) ----
    recon_ref[...] = (
        jnp.dot(z_q, dec_w_ref[...], preferred_element_type=jnp.float32)
        + dec_b_ref[...]
    )


def vqvae_fused(patches, enc_w, enc_b, cb, cb_sq, dec_w, dec_b, *,
                n_valid, codebook_length, tile_n):
    n_pad, p_pad = patches.shape
    c_pad = enc_w.shape[1]
    k_pad = cb.shape[0]
    num_tiles = n_pad // tile_n

    kernel = functools.partial(
        _vqvae_fused_kernel,
        n_valid=n_valid, k_real=codebook_length, tile_n=tile_n)

    grid_spec = pltpu.PrefetchScalarGridSpec(
        num_scalar_prefetch=0,
        grid=(num_tiles,),
        in_specs=[
            pl.BlockSpec((tile_n, p_pad), lambda i: (i, 0)),    # patches (stream)
            pl.BlockSpec((p_pad, c_pad), lambda i: (0, 0)),     # enc_w (resident)
            pl.BlockSpec((1, c_pad), lambda i: (0, 0)),         # enc_b
            pl.BlockSpec((k_pad, c_pad), lambda i: (0, 0)),     # codebook
            pl.BlockSpec((1, k_pad), lambda i: (0, 0)),         # ||e_k||^2
            pl.BlockSpec((c_pad, p_pad), lambda i: (0, 0)),     # dec_w
            pl.BlockSpec((1, p_pad), lambda i: (0, 0)),         # dec_b
        ],
        out_specs=(
            pl.BlockSpec((tile_n, p_pad), lambda i: (i, 0)),        # recon patches
            pl.BlockSpec((1, 1, tile_n), lambda i: (i, 0, 0)),      # indices
            pl.BlockSpec((1, 1, 1), lambda i: (i, 0, 0)),           # loss partial
            pl.BlockSpec((1, 1, k_pad), lambda i: (i, 0, 0)),       # freq partial
        ),
    )

    return pl.pallas_call(
        kernel,
        out_shape=(
            jax.ShapeDtypeStruct((n_pad, p_pad), jnp.float32),
            jax.ShapeDtypeStruct((num_tiles, 1, tile_n), jnp.int32),
            jax.ShapeDtypeStruct((num_tiles, 1, 1), jnp.float32),
            jax.ShapeDtypeStruct((num_tiles, 1, k_pad), jnp.float32),
        ),
        grid_spec=grid_spec,
        compiler_params=pltpu.CompilerParams(
            dimension_semantics=("parallel",)),                 # megacore
    )(patches, enc_w, enc_b, cb, cb_sq, dec_w, dec_b)


# ----------------------------------------------------------------------------
# VQVAE wrapper (parameter setup, lane padding, reshape glue in plain JAX)
# ----------------------------------------------------------------------------
class VQVAEPallas:
    def __init__(self, key, *, stems, sample_len, latent_dim, codebook_length,
                 conv_kernel, tile_n=256):
        assert sample_len % conv_kernel == 0
        assert tile_n % 128 == 0
        self.stems = stems
        self.sample_len = sample_len
        self.latent_dim = latent_dim
        self.codebook_length = codebook_length
        self.k = conv_kernel
        self.tile_n = tile_n
        self.emb_sample_len = sample_len // conv_kernel

        patch = stems * conv_kernel
        self.patch = patch
        # lane-dense padded dims (multiples of 128)
        self.p_pad = _round_up(patch, 128)
        self.c_pad = _round_up(latent_dim, 128)
        self.k_pad = _round_up(codebook_length, 128)

        k_cb, k_ew, k_eb, k_dw, k_db = jax.random.split(key, 5)
        # codebook init mirrors nn.Embedding.weight.uniform_(-1/K, 1/K)
        codebook = jax.random.uniform(
            k_cb, (codebook_length, latent_dim),
            minval=-1.0 / codebook_length, maxval=1.0 / codebook_length,
            dtype=jnp.float32)
        enc_w = 0.1 * jax.random.normal(k_ew, (patch, latent_dim), jnp.float32)
        enc_b = 0.1 * jax.random.normal(k_eb, (latent_dim,), jnp.float32)
        dec_w = 0.1 * jax.random.normal(k_dw, (latent_dim, patch), jnp.float32)
        dec_b = 0.1 * jax.random.normal(k_db, (patch,), jnp.float32)

        # zero-padded, kernel-resident copies (padding is exact: padded columns
        # of z_e and the codebook are 0, padded codebook rows are masked).
        self.codebook = jnp.pad(
            codebook, ((0, self.k_pad - codebook_length),
                       (0, self.c_pad - latent_dim)))
        # ||e_k||^2 precomputed once (resident row; saves per-tile reduce)
        self.codebook_sq = jnp.sum(
            self.codebook * self.codebook, axis=1).reshape(1, self.k_pad)
        self.enc_w = jnp.pad(
            enc_w, ((0, self.p_pad - patch), (0, self.c_pad - latent_dim)))
        self.enc_b = jnp.pad(
            enc_b, (0, self.c_pad - latent_dim)).reshape(1, self.c_pad)
        self.dec_w = jnp.pad(
            dec_w, ((0, self.c_pad - latent_dim), (0, self.p_pad - patch)))
        self.dec_b = jnp.pad(
            dec_b, (0, self.p_pad - patch)).reshape(1, self.p_pad)

        self.codebook_freq = jnp.zeros((codebook_length,), jnp.float32)

    def forward(self, x, is_train, batch_idx):
        b, s, length = x.shape
        w = length // self.k
        n = b * w

        # encoder patch extraction: (B, S, L) -> (B*W, S*k), zero-padded to
        # (N_pad, P_pad) so the streamed tiles are lane-dense.
        patches = (x.reshape(b, s, w, self.k)
                     .transpose(0, 2, 1, 3)
                     .reshape(n, self.patch))
        n_pad = _round_up(n, self.tile_n)
        patches = jnp.pad(
            patches, ((0, n_pad - n), (0, self.p_pad - self.patch)))

        recon_p, idx3, loss_p, freq_p = vqvae_fused(
            patches, self.enc_w, self.enc_b, self.codebook, self.codebook_sq,
            self.dec_w, self.dec_b,
            n_valid=n, codebook_length=self.codebook_length,
            tile_n=self.tile_n)

        # commitment loss: 0.75 * mse(z_e.detach(), z_q) + mse(z_e, z_q.detach())
        # == 1.75 * mse in value (detach only affects gradients).
        total_sq = jnp.sum(loss_p)
        comm_loss = 1.75 * total_sq / jnp.float32(n * self.latent_dim)

        # codebook usage histogram (self.codebook_freq[idx] += 1)
        freq = jnp.sum(freq_p, axis=(0, 1))[: self.codebook_length]
        self.codebook_freq = self.codebook_freq + freq

        # encoding indices (lane-dense per tile -> flat order over rows)
        encoding_indices = idx3.reshape(-1)[:n]

        # (codebook re-seeding branch runs only when batch_idx % 50 == 0 and
        #  batch_idx != 0 and is_train; with batch_idx == 0 it is skipped,
        #  matching the reference control flow.)

        # decoder output: (N_pad, P_pad) -> (B, S, L)
        recon = (recon_p[:n, : self.patch]
                 .reshape(b, w, s, self.k)
                 .transpose(0, 2, 1, 3)
                 .reshape(b, s, length))
        return recon, comm_loss, encoding_indices


if __name__ == "__main__":
    key = jax.random.PRNGKey(0)
    k_model, k_x = jax.random.split(key)

    B, STEMS, L = 2, 4, 32           # batch, audio sources, sample length
    LATENT, K_CODES, CONV_K = 16, 64, 4

    model = VQVAEPallas(k_model, stems=STEMS, sample_len=L,
                        latent_dim=LATENT, codebook_length=K_CODES,
                        conv_kernel=CONV_K)

    x = jax.random.normal(k_x, (B, STEMS, L), jnp.float32)   # NCW like PyTorch
    recon, comm_loss, indices = model.forward(x, is_train=True, batch_idx=0)
    jax.block_until_ready((recon, comm_loss, indices))

    n_rows = B * (L // CONV_K)
    assert recon.shape == (B, STEMS, L)
    assert indices.shape == (n_rows,)
    assert int(indices.min()) >= 0 and int(indices.max()) < K_CODES
    assert bool(jnp.isfinite(comm_loss))
    assert float(jnp.sum(model.codebook_freq)) == float(n_rows)
    print("KERNEL_OK")
</pallas_src>

<mosaic_0001>
module attributes {stable_mosaic.version = 11 : i64} {
  func.func @_vqvae_fused_kernel(%arg0: i32, %arg1: memref<256x128xf32, #tpu.memory_space<vmem>>, %arg2: memref<128x128xf32, #tpu.memory_space<vmem>>, %arg3: memref<1x128xf32, #tpu.memory_space<vmem>>, %arg4: memref<128x128xf32, #tpu.memory_space<vmem>>, %arg5: memref<1x128xf32, #tpu.memory_space<vmem>>, %arg6: memref<128x128xf32, #tpu.memory_space<vmem>>, %arg7: memref<1x128xf32, #tpu.memory_space<vmem>>, %arg8: memref<256x128xf32, #tpu.memory_space<vmem>>, %arg9: memref<1x1x256xi32, #tpu.memory_space<vmem>>, %arg10: memref<1x1x1xf32, #tpu.memory_space<vmem>>, %arg11: memref<1x1x128xf32, #tpu.memory_space<vmem>>) attributes {dimension_semantics = [#tpu.dimension_semantics<parallel>], iteration_bounds = array<i64: 1>, scalar_prefetch = 0 : i64, scratch_operands = 0 : i64, tpu.core_type = #tpu.core_type<tc>, window_params = [{transform_indices = @transform_0, window_bounds = array<i64: 256, 128>}, {pipeline_mode = #tpu.pipeline_mode<synchronous>, transform_indices = @transform_1, window_bounds = array<i64: 128, 128>}, {pipeline_mode = #tpu.pipeline_mode<synchronous>, transform_indices = @transform_2, window_bounds = array<i64: 1, 128>}, {pipeline_mode = #tpu.pipeline_mode<synchronous>, transform_indices = @transform_3, window_bounds = array<i64: 128, 128>}, {pipeline_mode = #tpu.pipeline_mode<synchronous>, transform_indices = @transform_4, window_bounds = array<i64: 1, 128>}, {pipeline_mode = #tpu.pipeline_mode<synchronous>, transform_indices = @transform_5, window_bounds = array<i64: 128, 128>}, {pipeline_mode = #tpu.pipeline_mode<synchronous>, transform_indices = @transform_6, window_bounds = array<i64: 1, 128>}, {transform_indices = @transform_7, window_bounds = array<i64: 256, 128>}, {transform_indices = @transform_8, window_bounds = array<i64: 1, 1, 256>}, {transform_indices = @transform_9, window_bounds = array<i64: 1, 1, 1>}, {transform_indices = @transform_10, window_bounds = array<i64: 1, 1, 128>}]} {
    %c0 = arith.constant 0 : index
    %c0_0 = arith.constant 0 : index
    %0 = vector.load %arg1[%c0, %c0_0] : memref<256x128xf32, #tpu.memory_space<vmem>>, vector<256x128xf32>
    %c0_1 = arith.constant 0 : index
    %c0_2 = arith.constant 0 : index
    %1 = vector.load %arg2[%c0_1, %c0_2] : memref<128x128xf32, #tpu.memory_space<vmem>>, vector<128x128xf32>
    %cst = arith.constant dense<0.000000e+00> : vector<256x128xf32>
    %2 = tpu.matmul %0, %1, %cst {dimension_numbers = #tpu.dot_dimension_numbers<[1], [0], [0], [1], [0, 0, 1, 1], [], []>} : vector<256x128xf32>, vector<128x128xf32>, vector<256x128xf32> -> vector<256x128xf32>
    %c0_3 = arith.constant 0 : index
    %c0_4 = arith.constant 0 : index
    %3 = vector.load %arg3[%c0_3, %c0_4] : memref<1x128xf32, #tpu.memory_space<vmem>>, vector<1x128xf32>
    %4 = vector.broadcast %3 : vector<1x128xf32> to vector<256x128xf32>
    %5 = arith.addf %2, %4 : vector<256x128xf32>
    %c0_5 = arith.constant 0 : index
    %c0_6 = arith.constant 0 : index
    %6 = vector.load %arg4[%c0_5, %c0_6] : memref<128x128xf32, #tpu.memory_space<vmem>>, vector<128x128xf32>
    %7 = arith.mulf %5, %5 : vector<256x128xf32>
    %cst_7 = arith.constant dense<0.000000e+00> : vector<256xf32>
    %8 = vector.multi_reduction <add>, %7, %cst_7 [1] : vector<256x128xf32> to vector<256xf32>
    %9 = vector.shape_cast %8 : vector<256xf32> to vector<256x1xf32>
    %cst_8 = arith.constant dense<0.000000e+00> : vector<256x128xf32>
    %10 = tpu.matmul %5, %6, %cst_8 {dimension_numbers = #tpu.dot_dimension_numbers<[1], [1], [0], [0], [0, 0, 1, 0], [], []>} : vector<256x128xf32>, vector<128x128xf32>, vector<256x128xf32> -> vector<256x128xf32>
    %c0_9 = arith.constant 0 : index
    %c0_10 = arith.constant 0 : index
    %11 = vector.load %arg5[%c0_9, %c0_10] : memref<1x128xf32, #tpu.memory_space<vmem>>, vector<1x128xf32>
    %12 = vector.broadcast %9 : vector<256x1xf32> to vector<256x128xf32>
    %13 = vector.broadcast %11 : vector<1x128xf32> to vector<256x128xf32>
    %14 = arith.addf %12, %13 : vector<256x128xf32>
    %cst_11 = arith.constant 2.000000e+00 : f32
    %15 = vector.broadcast %cst_11 : f32 to vector<256x128xf32>
    %16 = arith.mulf %15, %10 : vector<256x128xf32>
    %17 = arith.subf %14, %16 : vector<256x128xf32>
    %18 = tpu.iota {dimensions = array<i32: 1>} : vector<256x128xi32>
    %c64_i32 = arith.constant 64 : i32
    %19 = vector.broadcast %c64_i32 : i32 to vector<256x128xi32>
    %20 = arith.cmpi slt, %18, %19 : vector<256x128xi32>
    %cst_12 = arith.constant 0x7F800000 : f32
    %21 = vector.broadcast %cst_12 : f32 to vector<256x128xf32>
    %22 = arith.select %20, %17, %21 : vector<256x128xi1>, vector<256x128xf32>
    %cst_13 = arith.constant dense<0x7F800000> : vector<256xf32>
    %23 = vector.multi_reduction <minimumf>, %22, %cst_13 [1] : vector<256x128xf32> to vector<256xf32>
    %24 = vector.shape_cast %23 : vector<256xf32> to vector<256x1xf32>
    %25 = vector.broadcast %24 : vector<256x1xf32> to vector<256x128xf32>
    %26 = arith.cmpf ole, %22, %25 : vector<256x128xf32>
    %c128_i32 = arith.constant 128 : i32
    %27 = vector.broadcast %c128_i32 : i32 to vector<256x128xi32>
    %28 = arith.select %26, %18, %27 : vector<256x128xi1>, vector<256x128xi32>
    %cst_14 = arith.constant dense<2147483647> : vector<256xi32>
    %29 = vector.multi_reduction <minsi>, %28, %cst_14 [1] : vector<256x128xi32> to vector<256xi32>
    %30 = vector.shape_cast %29 : vector<256xi32> to vector<256x1xi32>
    %31 = tpu.iota {dimensions = array<i32: 0>} : vector<256x1xi32>
    %c256_i32 = arith.constant 256 : i32
    %32 = arith.muli %arg0, %c256_i32 : i32
    %33 = vector.broadcast %32 : i32 to vector<256x1xi32>
    %34 = arith.addi %31, %33 : vector<256x1xi32>
    %c16_i32 = arith.constant 16 : i32
    %35 = vector.broadcast %c16_i32 : i32 to vector<256x1xi32>
    %36 = arith.cmpi slt, %34, %35 : vector<256x1xi32>
    %c128_i32_15 = arith.constant 128 : i32
    %37 = vector.broadcast %c128_i32_15 : i32 to vector<256x1xi32>
    %38 = arith.select %36, %30, %37 : vector<256x1xi1>, vector<256x1xi32>
    %39 = vector.broadcast %38 : vector<256x1xi32> to vector<256x128xi32>
    %40 = arith.cmpi eq, %18, %39 : vector<256x128xi32>
    %41 = arith.extui %40 : vector<256x128xi1> to vector<256x128xi32>
    %42 = arith.sitofp %41 : vector<256x128xi32> to vector<256x128xf32>
    %cst_16 = arith.constant dense<0.000000e+00> : vector<256x128xf32>
    %43 = tpu.matmul %42, %6, %cst_16 {dimension_numbers = #tpu.dot_dimension_numbers<[1], [0], [0], [1], [0, 0, 1, 1], [], []>} : vector<256x128xf32>, vector<128x128xf32>, vector<256x128xf32> -> vector<256x128xf32>
    %cst_17 = arith.constant 0.000000e+00 : f32
    %44 = vector.broadcast %cst_17 : f32 to vector<256x1xf32>
    %45 = arith.maximumf %24, %44 : vector<256x1xf32>
    %cst_18 = arith.constant 0.000000e+00 : f32
    %46 = vector.broadcast %cst_18 : f32 to vector<256x1xf32>
    %47 = arith.select %36, %45, %46 : vector<256x1xi1>, vector<256x1xf32>
    %48 = vector.shape_cast %47 : vector<256x1xf32> to vector<1x256x1xf32>
    %cst_19 = arith.constant dense<0.000000e+00> : vector<1xf32>
    %49 = vector.multi_reduction <add>, %48, %cst_19 [1, 2] : vector<1x256x1xf32> to vector<1xf32>
    %50 = vector.shape_cast %49 : vector<1xf32> to vector<1x1x1xf32>
    %51 = vector.extract %50[0, 0, 0] : f32 from vector<1x1x1xf32>
    %52 = vector.broadcast %51 : f32 to vector<1x1x1xf32>
    %c0_20 = arith.constant 0 : index
    %c0_21 = arith.constant 0 : index
    %c0_22 = arith.constant 0 : index
    %53 = vector.load %arg10[%c0_20, %c0_21, %c0_22] : memref<1x1x1xf32, #tpu.memory_space<vmem>>, vector<1x1x1xf32>
    tpu.vector_store %arg10[%c0_20, %c0_21, %c0_22], %52 {strides = array<i32>} : memref<1x1x1xf32, #tpu.memory_space<vmem>>, vector<1x1x1xf32>,
    %cst_23 = arith.constant dense<0.000000e+00> : vector<128xf32>
    %54 = vector.multi_reduction <add>, %42, %cst_23 [0] : vector<256x128xf32> to vector<128xf32>
    %55 = vector.shape_cast %54 : vector<128xf32> to vector<1x128xf32>
    %56 = vector.shape_cast %55 : vector<1x128xf32> to vector<1x1x128xf32>
    %c0_24 = arith.constant 0 : index
    %c0_25 = arith.constant 0 : index
    %c0_26 = arith.constant 0 : index
    %57 = vector.load %arg11[%c0_24, %c0_25, %c0_26] : memref<1x1x128xf32, #tpu.memory_space<vmem>>, vector<1x1x128xf32>
    tpu.vector_store %arg11[%c0_24, %c0_25, %c0_26], %56 {strides = array<i32>} : memref<1x1x128xf32, #tpu.memory_space<vmem>>, vector<1x1x128xf32>,
    %58 = tpu.iota {dimensions = array<i32: 1>} : vector<1x128xi32>
    %59 = arith.sitofp %58 : vector<1x128xi32> to vector<1x128xf32>
    %cst_27 = arith.constant dense<0.000000e+00> : vector<1x256xf32>
    %60 = tpu.matmul %59, %42, %cst_27 {dimension_numbers = #tpu.dot_dimension_numbers<[1], [1], [0], [0], [0, 0, 1, 0], [], []>} : vector<1x128xf32>, vector<256x128xf32>, vector<1x256xf32> -> vector<1x256xf32>
    %61 = arith.fptosi %60 : vector<1x256xf32> to vector<1x256xi32>
    %62 = vector.shape_cast %61 : vector<1x256xi32> to vector<1x1x256xi32>
    %c0_28 = arith.constant 0 : index
    %c0_29 = arith.constant 0 : index
    %c0_30 = arith.constant 0 : index
    %63 = vector.load %arg9[%c0_28, %c0_29, %c0_30] : memref<1x1x256xi32, #tpu.memory_space<vmem>>, vector<1x1x256xi32>
    tpu.vector_store %arg9[%c0_28, %c0_29, %c0_30], %62 {strides = array<i32>} : memref<1x1x256xi32, #tpu.memory_space<vmem>>, vector<1x1x256xi32>,
    %c0_31 = arith.constant 0 : index
    %c0_32 = arith.constant 0 : index
    %64 = vector.load %arg6[%c0_31, %c0_32] : memref<128x128xf32, #tpu.memory_space<vmem>>, vector<128x128xf32>
    %cst_33 = arith.constant dense<0.000000e+00> : vector<256x128xf32>
    %65 = tpu.matmul %43, %64, %cst_33 {dimension_numbers = #tpu.dot_dimension_numbers<[1], [0], [0], [1], [0, 0, 1, 1], [], []>} : vector<256x128xf32>, vector<128x128xf32>, vector<256x128xf32> -> vector<256x128xf32>
    %c0_34 = arith.constant 0 : index
    %c0_35 = arith.constant 0 : index
    %66 = vector.load %arg7[%c0_34, %c0_35] : memref<1x128xf32, #tpu.memory_space<vmem>>, vector<1x128xf32>
    %67 = vector.broadcast %66 : vector<1x128xf32> to vector<256x128xf32>
    %68 = arith.addf %65, %67 : vector<256x128xf32>
    %c0_36 = arith.constant 0 : index
    %c0_37 = arith.constant 0 : index
    %69 = vector.load %arg8[%c0_36, %c0_37] : memref<256x128xf32, #tpu.memory_space<vmem>>, vector<256x128xf32>
    tpu.vector_store %arg8[%c0_36, %c0_37], %68 {strides = array<i32>} : memref<256x128xf32, #tpu.memory_space<vmem>>, vector<256x128xf32>,
    return
  }
  func.func @transform_0(%arg0: i32) -> (i32, i32) {
    %c0_i32 = arith.constant 0 : i32
    %c0_i32_0 = arith.constant 0 : i32
    return %arg0, %c0_i32 : i32, i32
  }
  func.func @transform_1(%arg0: i32) -> (i32, i32) {
    %c0_i32 = arith.constant 0 : i32
    %c0_i32_0 = arith.constant 0 : i32
    %c0_i32_1 = arith.constant 0 : i32
    return %c0_i32, %c0_i32_0 : i32, i32
  }
  func.func @transform_2(%arg0: i32) -> (i32, i32) {
    %c0_i32 = arith.constant 0 : i32
    %c0_i32_0 = arith.constant 0 : i32
    %c0_i32_1 = arith.constant 0 : i32
    return %c0_i32, %c0_i32_0 : i32, i32
  }
  func.func @transform_3(%arg0: i32) -> (i32, i32) {
    %c0_i32 = arith.constant 0 : i32
    %c0_i32_0 = arith.constant 0 : i32
    %c0_i32_1 = arith.constant 0 : i32
    return %c0_i32, %c0_i32_0 : i32, i32
  }
  func.func @transform_4(%arg0: i32) -> (i32, i32) {
    %c0_i32 = arith.constant 0 : i32
    %c0_i32_0 = arith.constant 0 : i32
    %c0_i32_1 = arith.constant 0 : i32
    return %c0_i32, %c0_i32_0 : i32, i32
  }
  func.func @transform_5(%arg0: i32) -> (i32, i32) {
    %c0_i32 = arith.constant 0 : i32
    %c0_i32_0 = arith.constant 0 : i32
    %c0_i32_1 = arith.constant 0 : i32
    return %c0_i32, %c0_i32_0 : i32, i32
  }
  func.func @transform_6(%arg0: i32) -> (i32, i32) {
    %c0_i32 = arith.constant 0 : i32
    %c0_i32_0 = arith.constant 0 : i32
    %c0_i32_1 = arith.constant 0 : i32
    return %c0_i32, %c0_i32_0 : i32, i32
  }
  func.func @transform_7(%arg0: i32) -> (i32, i32) {
    %c0_i32 = arith.constant 0 : i32
    %c0_i32_0 = arith.constant 0 : i32
    return %arg0, %c0_i32 : i32, i32
  }
  func.func @transform_8(%arg0: i32) -> (i32, i32, i32) {
    %c0_i32 = arith.constant 0 : i32
    %c0_i32_0 = arith.constant 0 : i32
    %c0_i32_1 = arith.constant 0 : i32
    return %arg0, %c0_i32, %c0_i32_0 : i32, i32, i32
  }
  func.func @transform_9(%arg0: i32) -> (i32, i32, i32) {
    %c0_i32 = arith.constant 0 : i32
    %c0_i32_0 = arith.constant 0 : i32
    %c0_i32_1 = arith.constant 0 : i32
    return %arg0, %c0_i32, %c0_i32_0 : i32, i32, i32
  }
  func.func @transform_10(%arg0: i32) -> (i32, i32, i32) {
    %c0_i32 = arith.constant 0 : i32
    %c0_i32_0 = arith.constant 0 : i32
    %c0_i32_1 = arith.constant 0 : i32
    return %arg0, %c0_i32, %c0_i32_0 : i32, i32, i32
  }
}

</mosaic_0001>

<bundles_post_ra>
// kernel: tpu_custom_call.1
= control target key start
LH: loop header
LB: loop body
LE: loop exit
PB: predicated region body
PF: predicated region fallthrough
CT: control target
= control target key end

     0   :  { %16 = vsyncpa [#allocation3], 0  ;;  %s3720_s0 = inlined_call_operand.hbm [shape: f32[256,128], index: 0, kind: input, shape index: {}]   ;;  %s3721_s1 = inlined_call_operand.hbm [shape: f32[128,128], index: 1, kind: input, shape index: {}]   ;;  %s3722_s2 = inlined_call_operand.vmem [shape: f32[1,128], index: 2, kind: input, shape index: {}]   ;;  %s3723_s3 = inlined_call_operand.hbm [shape: f32[128,128], index: 3, kind: input, shape index: {}]   ;;  %s3724_s4 = inlined_call_operand.vmem [shape: f32[1,128], index: 4, kind: input, shape index: {}]   ;;  %s3725_s5 = inlined_call_operand.hbm [shape: f32[128,128], index: 5, kind: input, shape index: {}]   ;;  %s3726_s6 = inlined_call_operand.vmem [shape: f32[1,128], index: 6, kind: input, shape index: {}]   ;;  %s3727_s7 = inlined_call_operand.hbm [shape: f32[256,128], index: 7, kind: output, shape index: {0}]   ;;  %s3728_s8 = inlined_call_operand.hbm [shape: s32[1,1,256], index: 8, kind: output, shape index: {1}]   ;;  %s3729_s9 = inlined_call_operand.hbm [shape: f32[1,1,1], index: 9, kind: output, shape index: {2}]   ;;  %s3730_s10 = inlined_call_operand.hbm [shape: f32[1,1,128], index: 10, kind: output, shape index: {3}]  }
   0x1   :  { %17 = vsyncpa [#allocation6], 0 }
   0x2   :  { %18 = vsyncpa [#allocation9], 0 }
   0x3   :  { %19 = vsyncpa [#allocation4], 0 }
   0x4   :  { %20 = vsyncpa [#allocation12], 0 }
   0x5   :  { %21 = vsyncpa [#allocation15], 0  ;;  %s3354_s13 = smov [#allocation5]   ;;  %s3355_s15 = smov [#allocation2]  }
   0x6   :  { %s39_s14 = sshll.u32 %s3354_s13, 4  ;;  %s27_s16 = sshll.u32 %s3355_s15, 4  ;;  %s40_s14 = int_to_ptr.vmem [resolvable:$true] %s39_s14  ;;  %s3426_s16 = int_to_ptr.vmem [resolvable:$true] %s27_s16 }
   0x7   :  { %s3166_s19 = scalar_lea.hbm %s3721_s1, 2048 }
   0x8   :  { %p3167_p0 = scmp.ne.s32.totalorder %s3721_s1, %s3166_s19  ;;  %p3170_p1 = scmp.lt.u32.totalorder %s3166_s19, %s3721_s1 }
   0xa   :  { %p3172_p2 = pnand %p3170_p1, %p3167_p0 }
   0xc   :  { %3175 = shalt.err (!%p3172_p2)
}
   0xd   :  { %s3176_s24 = scalar_lea.vmem %s40_s14, 2048  ;;  %p3181_p4 = scmp.lt.s32.totalorder %s40_s14, %s40_s14 }
   0xe   :  { %p3177_p3 = scmp.ne.s32.totalorder %s40_s14, %s3176_s24  ;;  %p3182_p5 = scmp.lt.s32.totalorder %s3176_s24, %s3176_s24 }
  0x10   :  { %p3183_p6 = por %p3182_p5, %p3181_p4 }
  0x12   :  { %p3184_p7 = pnand %p3183_p6, %p3177_p3 }
  0x14   :  { %3187 = shalt.err (!%p3184_p7)
}
  0x15   :  { %s3356_s25 = smov 128   ;;  %s3357_s26 = smov 8  }
  0x16   :  { %45 = dma.hbm_to_vmem [thread:$0]  %s3721_s1, 2048, %s40_s14, [#allocation6], %s3356_s25, %s3356_s25, %s3357_s26  }
  0x17   :  { %s3188_s11 = scalar_lea.hbm %s3720_s0, 4096 }
  0x18   :  { %p3189_p8 = scmp.ne.s32.totalorder %s3720_s0, %s3188_s11  ;;  %p3192_p9 = scmp.lt.u32.totalorder %s3188_s11, %s3720_s0 }
  0x1a   :  { %p3194_p10 = pnand %p3192_p9, %p3189_p8 }
  0x1c   :  { %3197 = shalt.err (!%p3194_p10)
}
  0x1d   :  { %s3198_s18 = scalar_lea.vmem %s3426_s16, 4096  ;;  %p3203_p12 = scmp.lt.s32.totalorder %s3426_s16, %s3426_s16 }
  0x1e   :  { %p3199_p11 = scmp.ne.s32.totalorder %s3426_s16, %s3198_s18  ;;  %p3204_p13 = scmp.lt.s32.totalorder %s3198_s18, %s3198_s18 }
  0x20   :  { %p3205_p0 = por %p3204_p13, %p3203_p12 }
  0x22   :  { %p3206_p1 = pnand %p3205_p0, %p3199_p11 }
  0x24   :  { %3209 = shalt.err (!%p3206_p1)
}
  0x25   :  { %33 = dma.hbm_to_vmem [thread:$0]  %s3720_s0, 4096, %s3426_s16, [#allocation3], %s3356_s25, %s3356_s25, %s3357_s26  }
  0x26   :  { %s3358_s19 = smov [#allocation7]   ;;  %s3359_s21 = smov [#allocation8]  }
  0x27   :  { %s53_s20 = sshll.u32 %s3358_s19, 4  ;;  %s67_s22 = sshll.u32 %s3359_s21, 4  ;;  %s54_s20 = int_to_ptr.vmem [resolvable:$true] %s53_s20  ;;  %s3463_s22 = int_to_ptr.vmem [resolvable:$true] %s67_s22 }
  0x28   :  { %s3210_s27 = scalar_lea.hbm %s3723_s3, 2048 }
  0x29   :  { %p3211_p2 = scmp.ne.s32.totalorder %s3723_s3, %s3210_s27  ;;  %p3214_p3 = scmp.lt.u32.totalorder %s3210_s27, %s3723_s3 }
  0x2b   :  { %p3216_p4 = pnand %p3214_p3, %p3211_p2 }
  0x2d   :  { %3219 = shalt.err (!%p3216_p4)
}
  0x2e   :  { %s3220_s0 = scalar_lea.vmem %s54_s20, 2048  ;;  %p3225_p6 = scmp.lt.s32.totalorder %s54_s20, %s54_s20 }
  0x2f   :  { %p3221_p5 = scmp.ne.s32.totalorder %s54_s20, %s3220_s0  ;;  %p3226_p7 = scmp.lt.s32.totalorder %s3220_s0, %s3220_s0 }
  0x31   :  { %p3227_p8 = por %p3226_p7, %p3225_p6 }
  0x33   :  { %p3228_p9 = pnand %p3227_p8, %p3221_p5 }
  0x35   :  { %3231 = shalt.err (!%p3228_p9)
}
  0x36   :  { %59 = dma.hbm_to_vmem [thread:$0]  %s3723_s3, 2048, %s54_s20, [#allocation6], %s3356_s25, %s3356_s25, %s3357_s26  }
  0x37   :  { %s3232_s17 = scalar_lea.hbm %s3725_s5, 2048 }
  0x38   :  { %p3233_p10 = scmp.ne.s32.totalorder %s3725_s5, %s3232_s17  ;;  %p3236_p11 = scmp.lt.u32.totalorder %s3232_s17, %s3725_s5 }
  0x3a   :  { %p3238_p12 = pnand %p3236_p11, %p3233_p10 }
  0x3c   :  { %3241 = shalt.err (!%p3238_p12)
}
  0x3d   :  { %s3242_s21 = scalar_lea.vmem %s3463_s22, 2048  ;;  %p3247_p0 = scmp.lt.s32.totalorder %s3463_s22, %s3463_s22 }
  0x3e   :  { %p3243_p13 = scmp.ne.s32.totalorder %s3463_s22, %s3242_s21  ;;  %p3248_p1 = scmp.lt.s32.totalorder %s3242_s21, %s3242_s21 }
  0x40   :  { %p3249_p2 = por %p3248_p1, %p3247_p0 }
  0x42   :  { %p3250_p3 = pnand %p3249_p2, %p3243_p13 }
  0x44   :  { %3253 = shalt.err (!%p3250_p3)
}
  0x45   :  { %73 = dma.hbm_to_vmem [thread:$0]  %s3725_s5, 2048, %s3463_s22, [#allocation9], %s3356_s25, %s3356_s25, %s3357_s26  }
  0x46   :  { %3342 = dma.done.wait [#allocation3], 4096  }
  0x47   :  { %3343 = vsyncadd [#allocation3], 4294963200 }
  0x48   :  { %3344 = dma.done.wait [#allocation6], 4096  }
  0x49   :  { %3345 = vsyncadd [#allocation6], 4294963200 }
  0x4a   :  { %3346 = dma.done.wait [#allocation9], 2048  }
  0x4b   :  { %3347 = vsyncadd [#allocation9], 4294965248  ;;  %v120_v0 = vld [vmem:[#allocation5] sm:$0xff]  ;;  %v121_v1 = vld [vmem:[#allocation5 + $0x8] sm:$0xff]  ;;  %vm1935_vm4 = vcmask 7168   ;;  %vm2009_vm9 = vcmask 0  }
  0x4c   :  { %v122_v2 = vld [vmem:[#allocation5 + $0x10] sm:$0xff]  ;;  %v3014_v3 = vpack.c.bf16 %v121_v1, %v120_v0  ;;  %v123_v4 = vld [vmem:[#allocation5 + $0x18] sm:$0xff]  ;;  %v124_v6 = vld [vmem:[#allocation5 + $0x20] sm:$0xff]  ;;  %vm3364_vm10 = vmmov 0   ;;  %s3367_s24 = smov [#allocation11]  }
  0x4d   :  { %v3018_v5 = vpack.c.bf16 %v123_v4, %v122_v2  ;;  %v125_v7 = vld [vmem:[#allocation5 + $0x28] sm:$0xff]  ;;  %v126_v9 = vld [vmem:[#allocation5 + $0x30] sm:$0xff]  ;;  %v88_v10 = vld [vmem:[#allocation2] sm:$0xff]  ;;  %s2441_s27 = sshll.u32 %s3367_s24, 4  ;;  %s2442_s27 = int_to_ptr.vmem [resolvable:$true] %s2441_s27 }
  0x4e   :  { %3015 = vmatprep.subr.bf16.mxu1 %v3014_v3  ;;  %v3022_v8 = vpack.c.bf16 %v125_v7, %v124_v6  ;;  %v127_v11 = vld [vmem:[#allocation5 + $0x38] sm:$0xff]  ;;  %2719 = vmatprep.mubr.f32.mxu1 %v88_v10  ;;  %v368_v12 = vld [vmem:[#allocation7] sm:$0xff]  ;;  %v369_v13 = vld [vmem:[#allocation7 + $0x8] sm:$0xff]  ;;  %s3254_s28 = scalar_lea.vmem %s2442_s27, 32  ;;  %p3259_p5 = scmp.lt.s32.totalorder %s2442_s27, %s2442_s27 }
  0x4f   :  { %3017 = vmatpush3.bf16.msra.mxu1 %v3014_v3  ;;  %v3500_v14 = vpack.c.bf16 %v369_v13, %v368_v12  ;;  %v370_v15 = vld [vmem:[#allocation7 + $0x10] sm:$0xff]  ;;  %v371_v16 = vld [vmem:[#allocation7 + $0x18] sm:$0xff]  ;;  %v3026_v17 = vpack.c.bf16 %v127_v11, %v126_v9  ;;  %v128_v18 = vld [vmem:[#allocation5 + $0x40] sm:$0xff]  ;;  %p3255_p4 = scmp.ne.s32.totalorder %s2442_s27, %s3254_s28  ;;  %p3260_p6 = scmp.lt.s32.totalorder %s3254_s28, %s3254_s28 }
  0x50   :  { %3019 = vmatprep.subr.bf16.mxu1 %v3018_v5  ;;  %v3502_v19 = vpack.c.bf16 %v371_v16, %v370_v15  ;;  %v129_v20 = vld [vmem:[#allocation5 + $0x48] sm:$0xff]  ;;  %v372_v21 = vld [vmem:[#allocation7 + $0x20] sm:$0xff]  ;;  %v130_v24 = vld [vmem:[#allocation5 + $0x50] sm:$0xff] }
  0x51   :  { %3079 = vmatprep.subr.bf16.mxu0 %v3500_v14  ;;  %v373_v22 = vld [vmem:[#allocation7 + $0x28] sm:$0xff]  ;;  %v3030_v23 = vpack.c.bf16 %v129_v20, %v128_v18  ;;  %v131_v26 = vld [vmem:[#allocation5 + $0x58] sm:$0xff]  ;;  %v374_v27 = vld [vmem:[#allocation7 + $0x30] sm:$0xff]  ;;  %p3261_p7 = por %p3260_p6, %p3259_p5 }
  0x52   :  { %3081 = vmatpush3.bf16.msra.mxu0 %v3500_v14  ;;  %v3507_v25 = vpack.c.bf16 %v373_v22, %v372_v21  ;;  %v375_v28 = vld [vmem:[#allocation7 + $0x38] sm:$0xff]  ;;  %v3034_v29 = vpack.c.bf16 %v131_v26, %v130_v24  ;;  %v132_v30 = vld [vmem:[#allocation5 + $0x60] sm:$0xff]  ;;  %v133_v32 = vld [vmem:[#allocation5 + $0x68] sm:$0xff] }
  0x53   :  { %3021 = vmatpush3.bf16.msra.mxu1 %v3018_v5  ;;  %3083 = vmatprep.subr.bf16.mxu0 %v3502_v19  ;;  %v3511_v31 = vpack.c.bf16 %v375_v28, %v374_v27  ;;  %v376_v33 = vld [vmem:[#allocation7 + $0x40] sm:$0xff]  ;;  %v377_v34 = vld [vmem:[#allocation7 + $0x48] sm:$0xff]  ;;  %v3038_v35 = vpack.c.bf16 %v133_v32, %v132_v30  ;;  %v134_v36 = vld [vmem:[#allocation5 + $0x70] sm:$0xff]  ;;  %p3262_p8 = pnand %p3261_p7, %p3255_p4 }
  0x54   :  { %3023 = vmatprep.subr.bf16.mxu1 %v3022_v8  ;;  %v3515_v37 = vpack.c.bf16 %v377_v34, %v376_v33  ;;  %v135_v38 = vld [vmem:[#allocation5 + $0x78] sm:$0xff]  ;;  %v378_v39 = vld [vmem:[#allocation7 + $0x50] sm:$0xff]  ;;  %v380_v43 = vld [vmem:[#allocation7 + $0x60] sm:$0xff] }
  0x55   :  { %v379_v40 = vld [vmem:[#allocation7 + $0x58] sm:$0xff]  ;;  %v3042_v41 = vpack.c.bf16 %v135_v38, %v134_v36  ;;  %v381_v44 = vld [vmem:[#allocation7 + $0x68] sm:$0xff]  ;;  %v382_v46 = vld [vmem:[#allocation7 + $0x70] sm:$0xff] }
  0x56   :  { %3085 = vmatpush3.bf16.msra.mxu0 %v3502_v19  ;;  %v3519_v42 = vpack.c.bf16 %v379_v40, %v378_v39  ;;  %v3523_v45 = vpack.c.bf16 %v381_v44, %v380_v43  ;;  %v383_v47 = vld [vmem:[#allocation7 + $0x78] sm:$0xff]  ;;  %v89_v48 = vld [vmem:[#allocation2 + $0x8] sm:$0xff]  ;;  %v90_v49 = vld [vmem:[#allocation2 + $0x10] sm:$0xff] }
  0x57   :  { %3025 = vmatpush3.bf16.msra.mxu1 %v3022_v8  ;;  %3087 = vmatprep.subr.bf16.mxu0 %v3507_v25  ;;  %v3528_v50 = vpack.c.bf16 %v383_v47, %v382_v46  ;;  %v91_v51 = vld [vmem:[#allocation2 + $0x18] sm:$0xff]  ;;  %v92_v52 = vld [vmem:[#allocation2 + $0x20] sm:$0xff]  ;;  %v93_v53 = vld [vmem:[#allocation2 + $0x28] sm:$0xff] }
  0x58   :  { %3027 = vmatprep.subr.bf16.mxu1 %v3026_v17  ;;  %v94_v54 = vld [vmem:[#allocation2 + $0x30] sm:$0xff]  ;;  %v95_v55 = vld [vmem:[#allocation2 + $0x38] sm:$0xff]  ;;  %v96_v56 = vld [vmem:[#allocation2 + $0x40] sm:$0xff] }
  0x59   :  { %v97_v57 = vld [vmem:[#allocation2 + $0x48] sm:$0xff]  ;;  %v98_v58 = vld [vmem:[#allocation2 + $0x50] sm:$0xff]  ;;  %v99_v59 = vld [vmem:[#allocation2 + $0x58] sm:$0xff] }
  0x5a   :  { %3089 = vmatpush3.bf16.msra.mxu0 %v3507_v25  ;;  %v100_v60 = vld [vmem:[#allocation2 + $0x60] sm:$0xff]  ;;  %v101_v61 = vld [vmem:[#allocation2 + $0x68] sm:$0xff]  ;;  %v102_v62 = vld [vmem:[#allocation2 + $0x70] sm:$0xff] }
  0x5b   :  { %3029 = vmatpush3.bf16.msra.mxu1 %v3026_v17  ;;  %3091 = vmatprep.subr.bf16.mxu0 %v3511_v31  ;;  %v103_v63 = vld [vmem:[#allocation2 + $0x78] sm:$0xff]  ;;  %v104_v0 = vld [vmem:[#allocation2 + $0x80] sm:$0xff]  ;;  %v105_v1 = vld [vmem:[#allocation2 + $0x88] sm:$0xff] }
  0x5c   :  { %3031 = vmatprep.subr.bf16.mxu1 %v3030_v23  ;;  %v106_v2 = vld [vmem:[#allocation2 + $0x90] sm:$0xff]  ;;  %v107_v3 = vld [vmem:[#allocation2 + $0x98] sm:$0xff]  ;;  %v108_v4 = vld [vmem:[#allocation2 + $0xa0] sm:$0xff] }
  0x5d   :  { %v109_v5 = vld [vmem:[#allocation2 + $0xa8] sm:$0xff]  ;;  %v110_v6 = vld [vmem:[#allocation2 + $0xb0] sm:$0xff]  ;;  %v111_v7 = vld [vmem:[#allocation2 + $0xb8] sm:$0xff] }
  0x5e   :  { %3093 = vmatpush3.bf16.msra.mxu0 %v3511_v31  ;;  %v112_v8 = vld [vmem:[#allocation2 + $0xc0] sm:$0xff]  ;;  %v113_v9 = vld [vmem:[#allocation2 + $0xc8] sm:$0xff]  ;;  %v114_v10 = vld [vmem:[#allocation2 + $0xd0] sm:$0xff] }
  0x5f   :  { %3033 = vmatpush3.bf16.msra.mxu1 %v3030_v23  ;;  %3095 = vmatprep.subr.bf16.mxu0 %v3515_v37  ;;  %v115_v11 = vld [vmem:[#allocation2 + $0xd8] sm:$0xff]  ;;  %v116_v12 = vld [vmem:[#allocation2 + $0xe0] sm:$0xff]  ;;  %v117_v13 = vld [vmem:[#allocation2 + $0xe8] sm:$0xff] }
  0x60   :  { %3035 = vmatprep.subr.bf16.mxu1 %v3034_v29  ;;  %v119_v15 = vld [vmem:[#allocation2 + $0xf8] sm:$0xff]  ;;  %v3551_v16 = vld [vmem:[%s3722_s2] ss:$0 sm:$0xff] }
  0x62   :  { %3097 = vmatpush3.bf16.msra.mxu0 %v3515_v37 }
  0x63   :  { %3037 = vmatpush3.bf16.msra.mxu1 %v3034_v29  ;;  %3099 = vmatprep.subr.bf16.mxu0 %v3519_v42 }
  0x64   :  { %3039 = vmatprep.subr.bf16.mxu1 %v3038_v35 }
  0x66   :  { %3101 = vmatpush3.bf16.msra.mxu0 %v3519_v42 }
  0x67   :  { %3041 = vmatpush3.bf16.msra.mxu1 %v3038_v35  ;;  %3103 = vmatprep.subr.bf16.mxu0 %v3523_v45 }
  0x68   :  { %3043 = vmatprep.subr.bf16.mxu1 %v3042_v41 }
  0x6a   :  { %3105 = vmatpush3.bf16.msra.mxu0 %v3523_v45 }
  0x6b   :  { %3045 = vmatpush3.bf16.msra.mxu1 %v3042_v41  ;;  %3107 = vmatprep.subr.bf16.mxu0 %v3528_v50 }
  0x6c   :  { %3047 = vmatprep.subr.bf16.mxu1 %v3500_v14 }
  0x6e   :  { %2720 = vmatmul.mubr.f32.vlgmr.msra.gmra.mrb[0].mxu1 %v89_v48  ;;  %3109 = vmatpush3.bf16.msra.mxu0 %v3528_v50 }
  0x6f   :  { %2722 = vmatprep.mubr.f32.mxu1 %v90_v49 }
  0x72   :  { %2723 = vmatmul.mubr.f32.gmra.mrb[2].mxu1 %v91_v51 }
  0x73   :  { %2725 = vmatprep.mubr.f32.mxu1 %v92_v52 }
  0x74   :  { %3049 = vmatpush3.bf16.xpose.msra.mxu1 %v3500_v14  ;;  %v118_v14 = vld [vmem:[#allocation2 + $0xf0] sm:$0xff] }
  0x75   :  { %3051 = vmatprep.subr.bf16.mxu1 %v3502_v19 }
  0x76   :  { %2726 = vmatmul.mubr.f32.gmra.mrb[4].mxu1 %v93_v53 }
  0x77   :  { %2728 = vmatprep.mubr.f32.mxu1 %v94_v54 }
  0x7a   :  { %2729 = vmatmul.mubr.f32.gmra.mrb[6].mxu1 %v95_v55 }
  0x7b   :  { %2731 = vmatprep.mubr.f32.mxu1 %v96_v56 }
  0x7c   :  { %3053 = vmatpush3.bf16.xpose.msra.mxu1 %v3502_v19 }
  0x7d   :  { %3055 = vmatprep.subr.bf16.mxu1 %v3507_v25 }
  0x7e   :  { %2732 = vmatmul.mubr.f32.gmra.mrb[8].mxu1 %v97_v57 }
  0x7f   :  { %2734 = vmatprep.mubr.f32.mxu1 %v98_v58 }
  0x82   :  { %2735 = vmatmul.mubr.f32.gmra.mrb[10].mxu1 %v99_v59 }
  0x83   :  { %2737 = vmatprep.mubr.f32.mxu1 %v100_v60 }
  0x84   :  { %3057 = vmatpush3.bf16.xpose.msra.mxu1 %v3507_v25 }
  0x85   :  { %3059 = vmatprep.subr.bf16.mxu1 %v3511_v31 }
  0x86   :  { %2738 = vmatmul.mubr.f32.gmra.mrb[12].mxu1 %v101_v61 }
  0x87   :  { %2740 = vmatprep.mubr.f32.mxu1 %v102_v62 }
  0x8a   :  { %2741 = vmatmul.mubr.f32.gmra.mrb[14].mxu1 %v103_v63 }
  0x8b   :  { %2743 = vmatprep.mubr.f32.mxu1 %v104_v0 }
  0x8c   :  { %3061 = vmatpush3.bf16.xpose.msra.mxu1 %v3511_v31 }
  0x8d   :  { %3063 = vmatprep.subr.bf16.mxu1 %v3515_v37 }
  0x8e   :  { %2744 = vmatmul.mubr.f32.gmra.mrb[16].mxu1 %v105_v1 }
  0x8f   :  { %2746 = vmatprep.mubr.f32.mxu1 %v106_v2 }
  0x92   :  { %2747 = vmatmul.mubr.f32.gmra.mrb[18].mxu1 %v107_v3 }
  0x93   :  { %2749 = vmatprep.mubr.f32.mxu1 %v108_v4 }
  0x94   :  { %3065 = vmatpush3.bf16.xpose.msra.mxu1 %v3515_v37 }
  0x95   :  { %3067 = vmatprep.subr.bf16.mxu1 %v3519_v42 }
  0x96   :  { %2750 = vmatmul.mubr.f32.gmra.mrb[20].mxu1 %v109_v5 }
  0x97   :  { %2752 = vmatprep.mubr.f32.mxu1 %v110_v6 }
  0x9a   :  { %2753 = vmatmul.mubr.f32.gmra.mrb[22].mxu1 %v111_v7 }
  0x9b   :  { %2755 = vmatprep.mubr.f32.mxu1 %v112_v8 }
  0x9c   :  { %3069 = vmatpush3.bf16.xpose.msra.mxu1 %v3519_v42 }
  0x9d   :  { %3071 = vmatprep.subr.bf16.mxu1 %v3523_v45 }
  0x9e   :  { %2756 = vmatmul.mubr.f32.gmra.mrb[24].mxu1 %v113_v9 }
  0x9f   :  { %2758 = vmatprep.mubr.f32.mxu1 %v114_v10 }
  0xa2   :  { %2759 = vmatmul.mubr.f32.gmra.mrb[26].mxu1 %v115_v11 }
  0xa3   :  { %2761 = vmatprep.mubr.f32.mxu1 %v116_v12 }
  0xa4   :  { %3073 = vmatpush3.bf16.xpose.msra.mxu1 %v3523_v45 }
  0xa5   :  { %3075 = vmatprep.subr.bf16.mxu1 %v3528_v50 }
  0xa6   :  { %2762 = vmatmul.mubr.f32.gmra.mrb[28].mxu1 %v117_v13 }
  0xa7   :  { %2764 = vmatprep.mubr.f32.mxu1 %v118_v14 }
  0xaa   :  { %2765 = vmatmul.mubr.f32.gmra.mrb[30].mxu1 %v119_v15 }
  0xac   :  { %3077 = vmatpush3.bf16.xpose.msra.mxu1 %v3528_v50 }
 0x141   :  { %v2721_v17 = vpop.f32.mrb[0].mxu1 }
 0x142   :  { %v209_v18 = vpop.f32.mrb[1].mxu1  ;;  %v215_v20 = vadd.f32 %v2721_v17, %v3551_v16 }
 0x143   :  { %v210_v19 = vadd.f32 %v3551_v16, %v209_v18 }
 0x144   :  { %v385_v22 = vmul.f32 %v215_v20, %v215_v20 }
 0x145   :  { %2799 = vmatprep.mubr.f32.mxu1 %v210_v19  ;;  %v384_v21 = vmul.f32 %v210_v19, %v210_v19  ;;  %v2724_v23 = vpop.f32.mrb[2].mxu1 }
 0x146   :  { %2800 = vmatmul.mubr.f32.vlgmr.msra.gmra.mrb[32].mxu1 %v215_v20  ;;  %v225_v24 = vadd.f32 %v2724_v23, %v3551_v16  ;;  %v219_v25 = vpop.f32.mrb[3].mxu1 }
 0x147   :  { %416 = vadd.xlane.f32.xlu0 %v384_v21  ;;  %v220_v26 = vadd.f32 %v3551_v16, %v219_v25  ;;  %v808_v21 = vlaneseq }
 0x149   :  { %v2727_v27 = vpop.f32.mrb[4].mxu1  ;;  %2802 = vmatprep.mubr.f32.mxu1 %v220_v26  ;;  %v3589_v23 = vand.u32 127, %v808_v21  ;;  %vm2140_vm11 = vcmp.lt.s32.totalorder %v808_v21, 256 }
 0x14a   :  { %v229_v28 = vpop.f32.mrb[5].mxu1  ;;  %v235_v31 = vadd.f32 %v2727_v27, %v3551_v16  ;;  %2803 = vmatmul.mubr.f32.gmra.mrb[34].mxu1 %v225_v24 }
 0x14b   :  { %418 = vadd.xlane.f32.xlu0 %v385_v22  ;;  %v230_v29 = vadd.f32 %v3551_v16, %v229_v28  ;;  %v2484_v22 = vld [vmem:[%s3724_s4] ss:$0 sm:$0xff]  ;;  %vm810_vm0 = vcmp.lt.s32.totalorder %v3589_v23, 64 }
 0x14d   :  { %v2730_v30 = vpop.f32.mrb[6].mxu1  ;;  %2805 = vmatprep.mubr.f32.mxu1 %v230_v29 }
 0x14e   :  { %v239_v32 = vpop.f32.mrb[7].mxu1  ;;  %v245_v37 = vadd.f32 %v2730_v30, %v3551_v16  ;;  %2806 = vmatmul.mubr.f32.gmra.mrb[36].mxu1 %v235_v31 }
 0x14f   :  { %v240_v33 = vadd.f32 %v3551_v16, %v239_v32 }
 0x151   :  { %v2733_v34 = vpop.f32.mrb[8].mxu1  ;;  %2808 = vmatprep.mubr.f32.mxu1 %v240_v33 }
 0x152   :  { %v249_v35 = vpop.f32.mrb[9].mxu1  ;;  %v255_v43 = vadd.f32 %v2733_v34, %v3551_v16  ;;  %2809 = vmatmul.mubr.f32.gmra.mrb[38].mxu1 %v245_v37 }
 0x153   :  { %v250_v39 = vadd.f32 %v3551_v16, %v249_v35 }
 0x155   :  { %v2736_v36 = vpop.f32.mrb[10].mxu1  ;;  %2811 = vmatprep.mubr.f32.mxu1 %v250_v39 }
 0x156   :  { %v259_v38 = vpop.f32.mrb[11].mxu1  ;;  %v265_v49 = vadd.f32 %v2736_v36, %v3551_v16  ;;  %2812 = vmatmul.mubr.f32.gmra.mrb[40].mxu1 %v255_v43 }
 0x157   :  { %v260_v45 = vadd.f32 %v3551_v16, %v259_v38 }
 0x159   :  { %v2739_v40 = vpop.f32.mrb[12].mxu1  ;;  %2814 = vmatprep.mubr.f32.mxu1 %v260_v45 }
 0x15a   :  { %v269_v41 = vpop.f32.mrb[13].mxu1  ;;  %v275_v55 = vadd.f32 %v2739_v40, %v3551_v16  ;;  %2815 = vmatmul.mubr.f32.gmra.mrb[42].mxu1 %v265_v49 }
 0x15b   :  { %v270_v51 = vadd.f32 %v3551_v16, %v269_v41 }
 0x15d   :  { %v2742_v42 = vpop.f32.mrb[14].mxu1  ;;  %2817 = vmatprep.mubr.f32.mxu1 %v270_v51 }
 0x15e   :  { %v279_v44 = vpop.f32.mrb[15].mxu1  ;;  %v285_v60 = vadd.f32 %v2742_v42, %v3551_v16  ;;  %2818 = vmatmul.mubr.f32.gmra.mrb[44].mxu1 %v275_v55 }
 0x15f   :  { %v280_v58 = vadd.f32 %v3551_v16, %v279_v44 }
 0x161   :  { %v2745_v46 = vpop.f32.mrb[16].mxu1  ;;  %2820 = vmatprep.mubr.f32.mxu1 %v280_v58 }
 0x162   :  { %v289_v47 = vpop.f32.mrb[17].mxu1  ;;  %v295_v2 = vadd.f32 %v2745_v46, %v3551_v16  ;;  %2821 = vmatmul.mubr.f32.gmra.mrb[46].mxu1 %v285_v60 }
 0x163   :  { %v290_v63 = vadd.f32 %v3551_v16, %v289_v47 }
 0x165   :  { %v2748_v48 = vpop.f32.mrb[18].mxu1  ;;  %2823 = vmatprep.mubr.f32.mxu1 %v290_v63 }
 0x166   :  { %v299_v50 = vpop.f32.mrb[19].mxu1  ;;  %v305_v8 = vadd.f32 %v2748_v48, %v3551_v16  ;;  %2824 = vmatmul.mubr.f32.gmra.mrb[48].mxu1 %v295_v2 }
 0x167   :  { %v300_v5 = vadd.f32 %v3551_v16, %v299_v50 }
 0x169   :  { %v2751_v52 = vpop.f32.mrb[20].mxu1  ;;  %2826 = vmatprep.mubr.f32.mxu1 %v300_v5 }
 0x16a   :  { %v309_v53 = vpop.f32.mrb[21].mxu1  ;;  %v315_v14 = vadd.f32 %v2751_v52, %v3551_v16  ;;  %2827 = vmatmul.mubr.f32.gmra.mrb[50].mxu1 %v305_v8 }
 0x16b   :  { %v310_v11 = vadd.f32 %v3551_v16, %v309_v53 }
 0x16d   :  { %v2754_v54 = vpop.f32.mrb[22].mxu1  ;;  %2829 = vmatprep.mubr.f32.mxu1 %v310_v11 }
 0x16e   :  { %v325_v56 = vadd.f32 %v2754_v54, %v3551_v16  ;;  %v319_v57 = vpop.f32.mrb[23].mxu1  ;;  %2830 = vmatmul.mubr.f32.gmra.mrb[52].mxu1 %v315_v14 }
 0x16f   :  { %v320_v18 = vadd.f32 %v3551_v16, %v319_v57 }
 0x171   :  { %v2757_v59 = vpop.f32.mrb[24].mxu1  ;;  %2832 = vmatprep.mubr.f32.mxu1 %v320_v18 }
 0x172   :  { %v335_v61 = vadd.f32 %v2757_v59, %v3551_v16  ;;  %v329_v62 = vpop.f32.mrb[25].mxu1  ;;  %2833 = vmatmul.mubr.f32.gmra.mrb[54].mxu1 %v325_v56 }
 0x173   :  { %v330_v0 = vadd.f32 %v3551_v16, %v329_v62 }
 0x175   :  { %v2760_v1 = vpop.f32.mrb[26].mxu1  ;;  %2835 = vmatprep.mubr.f32.mxu1 %v330_v0 }
 0x176   :  { %v345_v3 = vadd.f32 %v2760_v1, %v3551_v16  ;;  %v339_v4 = vpop.f32.mrb[27].mxu1  ;;  %2836 = vmatmul.mubr.f32.gmra.mrb[56].mxu1 %v335_v61 }
 0x177   :  { %v340_v6 = vadd.f32 %v3551_v16, %v339_v4 }
 0x179   :  { %v2763_v7 = vpop.f32.mrb[28].mxu1  ;;  %2838 = vmatprep.mubr.f32.mxu1 %v340_v6 }
 0x17a   :  { %v355_v9 = vadd.f32 %v2763_v7, %v3551_v16  ;;  %v349_v10 = vpop.f32.mrb[29].mxu1  ;;  %2839 = vmatmul.mubr.f32.gmra.mrb[58].mxu1 %v345_v3 }
 0x17b   :  { %v350_v12 = vadd.f32 %v3551_v16, %v349_v10 }
 0x17d   :  { %v2766_v13 = vpop.f32.mrb[30].mxu1  ;;  %2841 = vmatprep.mubr.f32.mxu1 %v350_v12 }
 0x17e   :  { %v365_v15 = vadd.f32 %v2766_v13, %v3551_v16  ;;  %v359_v17 = vpop.f32.mrb[31].mxu1  ;;  %2842 = vmatmul.mubr.f32.gmra.mrb[60].mxu1 %v355_v9 }
 0x17f   :  { %v360_v19 = vadd.f32 %v3551_v16, %v359_v17 }
 0x181   :  { %2844 = vmatprep.mubr.f32.mxu1 %v360_v19 }
 0x182   :  { %2845 = vmatmul.mubr.f32.gmra.mrb[62].mxu1 %v365_v15 }
 0x1d4   :  { %v417_v20 = vpop.xlane.xlu0 %416 }
 0x1d5   :  { %v712_v26 = vadd.f32 %v2484_v22, %v417_v20 }
 0x1d8   :  { %v419_v24 = vpop.xlane.xlu0 %418 }
 0x1d9   :  { %v713_v29 = vadd.f32 %v2484_v22, %v419_v24  ;;  %v2143_v24 = vld [vmem:[#allocation8] sm:$0xff] }
 0x219   :  { %v2801_v16 = vpop.f32.mrb[32].mxu1 }
 0x21a   :  { %v546_v25 = vpop.f32.mrb[33].mxu1  ;;  %v745_v27 = vmul.f32 2.0, %v2801_v16  ;;  %v3360_v16 = vmov 0.0|0.0  }
 0x21b   :  { %v744_v28 = vmul.f32 2.0, %v546_v25  ;;  %3110 = vmatprep.subr.bf16.mxu1 %v3360_v16  ;;  %v2144_v25 = vld [vmem:[#allocation8 + $0x8] sm:$0xff] }
 0x21c   :  { %v777_v32 = vsub.f32 %v713_v29, %v745_v27 }
 0x21d   :  { %v776_v30 = vsub.f32 %v712_v26, %v744_v28  ;;  %v2804_v34 = vpop.f32.mrb[34].mxu1  ;;  %v3113_v26 = vpack.c.bf16 %v2144_v25, %v2143_v24 }
 0x21e   :  { %v812_v33 = vsel %vm810_vm0, %v777_v32, inf  ;;  %v556_v35 = vpop.f32.mrb[35].mxu1 }
 0x21f   :  { %v811_v31 = vsel %vm810_vm0, %v776_v30, inf  ;;  %3114 = vmatprep.subr.bf16.mxu0 %v3113_v26 }
 0x220   :  { %843 = vmin.xlane.f32.xlu1 %v811_v31 }
 0x221   :  { %v2807_v36 = vpop.f32.mrb[36].mxu1 }
 0x222   :  { %v566_v37 = vpop.f32.mrb[37].mxu1 }
 0x224   :  { %845 = vmin.xlane.f32.xlu1 %v812_v33 }
 0x225   :  { %v2810_v38 = vpop.f32.mrb[38].mxu1 }
 0x226   :  { %v576_v39 = vpop.f32.mrb[39].mxu1  ;;  %v3361_v38 = vmov 1.0  }
 0x227   :  { %v2145_v39 = vld [vmem:[#allocation8 + $0x10] sm:$0xff] }
 0x229   :  { %v2813_v40 = vpop.f32.mrb[40].mxu1 }
 0x22a   :  { %v586_v41 = vpop.f32.mrb[41].mxu1  ;;  %v2146_v40 = vld [vmem:[#allocation8 + $0x18] sm:$0xff] }
 0x22d   :  { %v2816_v42 = vpop.f32.mrb[42].mxu1 }
 0x22e   :  { %v596_v43 = vpop.f32.mrb[43].mxu1 }
 0x231   :  { %v2819_v44 = vpop.f32.mrb[44].mxu1 }
 0x232   :  { %v606_v45 = vpop.f32.mrb[45].mxu1  ;;  %v3117_v44 = vpack.c.bf16 %v2146_v40, %v2145_v39 }
 0x233   :  { %v3362_v45 = vmov 0.0  }
 0x234   :  { %2931 = vmatprep.mubr.msk.f32.mxu1 %vm3364_vm10, %v3362_v45 }
 0x235   :  { %v2822_v46 = vpop.f32.mrb[46].mxu1 }
 0x236   :  { %v616_v47 = vpop.f32.mrb[47].mxu1 }
 0x239   :  { %v2825_v48 = vpop.f32.mrb[48].mxu1 }
 0x23a   :  { %v626_v49 = vpop.f32.mrb[49].mxu1  ;;  %v2147_v48 = vld [vmem:[#allocation8 + $0x20] sm:$0xff] }
 0x23b   :  { %v2148_v49 = vld [vmem:[#allocation8 + $0x28] sm:$0xff] }
 0x23d   :  { %v2828_v50 = vpop.f32.mrb[50].mxu1 }
 0x23e   :  { %v636_v51 = vpop.f32.mrb[51].mxu1 }
 0x23f   :  { %v3363_v51 = vmov 1.0|1.0  }
 0x241   :  { %v2831_v52 = vpop.f32.mrb[52].mxu1 }
 0x242   :  { %v646_v53 = vpop.f32.mrb[53].mxu1 }
 0x245   :  { %v2834_v54 = vpop.f32.mrb[54].mxu1 }
 0x246   :  { %v656_v55 = vpop.f32.mrb[55].mxu1 }
 0x247   :  { %v3121_v55 = vpack.c.bf16 %v2148_v49, %v2147_v48 }
 0x249   :  { %v2837_v56 = vpop.f32.mrb[56].mxu1 }
 0x24a   :  { %v666_v57 = vpop.f32.mrb[57].mxu1  ;;  %v2149_v56 = vld [vmem:[#allocation8 + $0x30] sm:$0xff] }
 0x24b   :  { %v2150_v57 = vld [vmem:[#allocation8 + $0x38] sm:$0xff] }
 0x24d   :  { %v2840_v58 = vpop.f32.mrb[58].mxu1 }
 0x24e   :  { %v676_v59 = vpop.f32.mrb[59].mxu1 }
 0x251   :  { %v2843_v60 = vpop.f32.mrb[60].mxu1 }
 0x252   :  { %v686_v61 = vpop.f32.mrb[61].mxu1  ;;  %v3125_v60 = vpack.c.bf16 %v2150_v57, %v2149_v56  ;;  %v3366_v56 = vmov 0  }
 0x255   :  { %v2846_v62 = vpop.f32.mrb[62].mxu1 }
 0x256   :  { %v696_v63 = vpop.f32.mrb[63].mxu1  ;;  %v2151_v62 = vld [vmem:[#allocation8 + $0x40] sm:$0xff] }
 0x257   :  { %v2152_v63 = vld [vmem:[#allocation8 + $0x48] sm:$0xff] }
 0x2ad   :  { %v844_v0 = vpop.xlane.xlu1 %843 }
 0x2ae   :  { %vm907_vm1 = vcmp.le.f32.partialorder %v811_v31, %v844_v0  ;;  %v1871_v10 = vmax.f32 %v844_v0, 0.0 }
 0x2af   :  { %v939_v1 = vsel %vm907_vm1, %v3589_v23, 128 }
 0x2b0   :  { %v972_v2 = vshra.s32 %v939_v1, 16  ;;  %v971_v8 = vand.u32 65535, %v939_v1  ;;  %v1936_v19 = vsel %vm1935_vm4, %v1871_v10, 0.0  ;;  %v3129_v1 = vpack.c.bf16 %v2152_v63, %v2151_v62  ;;  %v2157_v10 = vld [vmem:[#allocation8 + $0x70] sm:$0xff] }
 0x2b1   :  { %v846_v3 = vpop.xlane.xlu1 %845 }
 0x2b2   :  { %vm908_vm2 = vcmp.le.f32.partialorder %v812_v33, %v846_v3  ;;  %v974_v4 = vcvt.s32.f32 %v972_v2  ;;  %v1872_v9 = vmax.f32 %v846_v3, 0.0  ;;  %v973_v12 = vcvt.s32.f32 %v971_v8  ;;  %v2153_v3 = vld [vmem:[#allocation8 + $0x50] sm:$0xff]  ;;  %v2156_v8 = vld [vmem:[#allocation8 + $0x68] sm:$0xff] }
 0x2b3   :  { %v940_v5 = vsel %vm908_vm2, %v3589_v23, 128 }
 0x2b4   :  { %975 = vmin.xlane.f32.xlu0 %v974_v4  ;;  %v986_v6 = vshra.s32 %v940_v5, 16  ;;  %v985_v13 = vand.u32 65535, %v940_v5  ;;  %v1937_v15 = vsel %vm1935_vm4, %v1872_v9, 0.0 }
 0x2b5   :  { %v1938_v20 = vadd.f32 %v1937_v15, %v1936_v19 }
 0x2b6   :  { %v988_v7 = vcvt.s32.f32 %v986_v6  ;;  %v987_v18 = vcvt.s32.f32 %v985_v13 }
 0x2b8   :  { %989 = vmin.xlane.f32.xlu1 %v988_v7 }
 0x341   :  { %v976_v11 = vpop.xlane.xlu0 %975 }
 0x342   :  { %vm977_vm3 = vcmp.eq.f32.partialorder %v974_v4, %v976_v11  ;;  %v982_v27 = vcvt.f32.s32 %v976_v11  ;;  %v2154_v4 = vld [vmem:[#allocation8 + $0x58] sm:$0xff] }
 0x343   :  { %v978_v14 = vsel %vm977_vm3, %v973_v12, inf  ;;  %v3133_v6 = vpack.c.bf16 %v2154_v4, %v2153_v3  ;;  %v2158_v11 = vld [vmem:[#allocation8 + $0x78] sm:$0xff] }
 0x344   :  { %979 = vmin.xlane.f32.xlu0 %v978_v14  ;;  %v983_v29 = vshll.u32 %v982_v27, 16  ;;  %v3141_v12 = vpack.c.bf16 %v2158_v11, %v2157_v10  ;;  %v2049_v14 = vcvt.s32.f32 %v3589_v23 }
 0x345   :  { %v990_v17 = vpop.xlane.xlu1 %989 }
 0x346   :  { %vm991_vm5 = vcmp.eq.f32.partialorder %v988_v7, %v990_v17  ;;  %v996_v30 = vcvt.f32.s32 %v990_v17  ;;  %v2155_v7 = vld [vmem:[#allocation8 + $0x60] sm:$0xff] }
 0x347   :  { %v992_v22 = vsel %vm991_vm5, %v987_v18, inf  ;;  %v3137_v9 = vpack.c.bf16 %v2156_v8, %v2155_v7 }
 0x348   :  { %993 = vmin.xlane.f32.xlu1 %v992_v22  ;;  %1999 = vadd.xlane.f32.xlu0 %v1938_v20  ;;  %v997_v35 = vshll.u32 %v996_v30, 16 }
 0x3d1   :  { %v980_v28 = vpop.xlane.xlu0 %979 }
 0x3d2   :  { %v981_v31 = vcvt.f32.s32 %v980_v28 }
 0x3d4   :  { %v984_v32 = vadd.s32 %v983_v29, %v981_v31 }
 0x3d5   :  { %v994_v33 = vpop.xlane.xlu1 %993  ;;  %v2000_v34 = vpop.xlane.xlu0 %1999 }
 0x3d6   :  { %v995_v36 = vcvt.f32.s32 %v994_v33  ;;  %v2001_v37 = vrot.slane %v2000_v34, 4  ;;  %vm1550_vm6 = vcmp.eq.s32.totalorder %v3589_v23, %v984_v32 }
 0x3d7   :  { %2879 = vmatprep.mubr.msk.f32.mxu0 %vm1550_vm6, %v3361_v38  ;;  %v2485_v46 = vsel %vm1550_vm6, 1.0, %v3362_v45 }
 0x3d8   :  { %v998_v41 = vadd.s32 %v997_v35, %v995_v36  ;;  %v2002_v42 = vadd.f32 %v2001_v37, %v2000_v34 }
 0x3da   :  { %v2003_v43 = vrot.slane %v2002_v42, 2  ;;  %vm1551_vm7 = vcmp.eq.s32.totalorder %v3589_v23, %v998_v41 }
 0x3db   :  { %v2486_v47 = vsel %vm1551_vm7, 1.0, %v3362_v45  ;;  %2880 = vmatmul.mubr.msk.f32.vlgmr.msra.gmra.mrb[0].mxu0 %vm1551_vm7, %v3361_v38  ;;  %vm3111_vm8 = vmpackc.low %vm1551_vm7, %vm1550_vm6 }
 0x3dc   :  { %v2011_v50 = vadd.f32 %v2486_v47, %v2485_v46  ;;  %3112 = vmatpush3.bf16.xpose.msk.msra.mxu1 %vm3111_vm8, %v3363_v51  ;;  %2882 = vmatprep.mubr.f32.mxu0 %v3362_v45  ;;  %v2004_v52 = vadd.f32 %v2003_v43, %v2002_v42  ;;  %v3365_v51 = vmov 1966171168  }
 0x3dd   :  { %3116 = vmatpush3.bf16.msra.mxu0 %v3113_v26 }
 0x3de   :  { %v2042_v53 = vrot.slane %v2011_v50, 4  ;;  %v2005_v54 = vrot.slane %v2004_v52, 1  ;;  %3118 = vmatprep.subr.bf16.mxu0 %v3117_v44 }
 0x3df   :  { %2883 = vmatmul.mubr.f32.gmra.mrb[2].mxu0 %v3362_v45 }
 0x3e0   :  { %2885 = vmatprep.mubr.f32.mxu0 %v3362_v45  ;;  %v2006_v58 = vadd.f32 %v2005_v54, %v2004_v52  ;;  %v2043_v59 = vadd.f32 %v2042_v53, %v2011_v50  ;;  %v2125_v52 = vunpack.c.l.s4 %v3365_v51  ;;  %v2128_v53 = vshrl.u32 %v808_v21, 7 }
 0x3e1   :  { %3120 = vmatpush3.bf16.msra.mxu0 %v3117_v44 }
 0x3e2   :  { %3145 = vpush %v2006_v58  ;;  %3122 = vmatprep.subr.bf16.mxu0 %v3121_v55  ;;  %v2044_v61 = vrot.slane %v2043_v59, 2 }
 0x3e3   :  { %2886 = vmatmul.mubr.f32.gmra.mrb[4].mxu0 %v3362_v45  ;;  %2932 = vmatmul.mubr.f32.vlgmr.msra.gmra.mrb[64].mxu1 %v2049_v14 }
 0x3e4   :  { %2888 = vmatprep.mubr.f32.mxu0 %v3362_v45  ;;  %v2045_v0 = vadd.f32 %v2044_v61, %v2043_v59 }
 0x3e5   :  { %3124 = vmatpush3.bf16.msra.mxu0 %v3121_v55  ;;  %v2126_v55 = vunpack.c.0.s8 %v2125_v52 }
 0x3e6   :  { %3126 = vmatprep.subr.bf16.mxu0 %v3125_v60  ;;  %v2046_v2 = vrot.slane %v2045_v0, 1 }
 0x3e7   :  { %2889 = vmatmul.mubr.f32.gmra.mrb[6].mxu0 %v3362_v45  ;;  %v2129_v58 = vsub.s32 %v2126_v55, %v2128_v53 }
 0x3e8   :  { %2891 = vmatprep.mubr.f32.mxu0 %v3362_v45  ;;  %v2047_v5 = vadd.f32 %v2046_v2, %v2045_v0 }
 0x3e9   :  { %3128 = vmatpush3.bf16.msra.mxu0 %v3125_v60 }
 0x3ea   :  { %3130 = vmatprep.subr.bf16.mxu0 %v3129_v1  ;;  %2048 = vst [vmem:[#allocation14] sm:$0x1] %v2047_v5 }
 0x3eb   :  { %2892 = vmatmul.mubr.f32.gmra.mrb[8].mxu0 %v3362_v45 }
 0x3ec   :  { %2894 = vmatprep.mubr.f32.mxu0 %v3362_v45 }
 0x3ed   :  { %3132 = vmatpush3.bf16.msra.mxu0 %v3129_v1 }
 0x3ee   :  { %3134 = vmatprep.subr.bf16.mxu0 %v3133_v6 }
 0x3ef   :  { %2895 = vmatmul.mubr.f32.gmra.mrb[10].mxu0 %v3362_v45 }
 0x3f0   :  { %2897 = vmatprep.mubr.f32.mxu0 %v3362_v45 }
 0x3f1   :  { %3136 = vmatpush3.bf16.msra.mxu0 %v3133_v6 }
 0x3f2   :  { %3138 = vmatprep.subr.bf16.mxu0 %v3137_v9 }
 0x3f3   :  { %2898 = vmatmul.mubr.f32.gmra.mrb[12].mxu0 %v3362_v45 }
 0x3f4   :  { %2900 = vmatprep.mubr.f32.mxu0 %v3362_v45 }
 0x3f5   :  { %3140 = vmatpush3.bf16.msra.mxu0 %v3137_v9 }
 0x3f6   :  { %3142 = vmatprep.subr.bf16.mxu0 %v3141_v12 }
 0x3f7   :  { %2901 = vmatmul.mubr.f32.gmra.mrb[14].mxu0 %v3362_v45 }
 0x3f8   :  { %2903 = vmatprep.mubr.f32.mxu0 %v3362_v45 }
 0x3f9   :  { %3144 = vmatpush3.bf16.msra.mxu0 %v3141_v12 }
 0x3fb   :  { %2904 = vmatmul.mubr.f32.gmra.mrb[16].mxu0 %v3362_v45 }
 0x3fc   :  { %2906 = vmatprep.mubr.f32.mxu0 %v3362_v45 }
 0x3ff   :  { %2907 = vmatmul.mubr.f32.gmra.mrb[18].mxu0 %v3362_v45 }
 0x400   :  { %2909 = vmatprep.mubr.f32.mxu0 %v3362_v45 }
 0x403   :  { %2910 = vmatmul.mubr.f32.gmra.mrb[20].mxu0 %v3362_v45 }
 0x404   :  { %2912 = vmatprep.mubr.f32.mxu0 %v3362_v45 }
 0x407   :  { %2913 = vmatmul.mubr.f32.gmra.mrb[22].mxu0 %v3362_v45 }
 0x408   :  { %2915 = vmatprep.mubr.f32.mxu0 %v3362_v45 }
 0x40b   :  { %2916 = vmatmul.mubr.f32.gmra.mrb[24].mxu0 %v3362_v45 }
 0x40c   :  { %2918 = vmatprep.mubr.f32.mxu0 %v3362_v45 }
 0x40f   :  { %2919 = vmatmul.mubr.f32.gmra.mrb[26].mxu0 %v3362_v45 }
 0x410   :  { %2921 = vmatprep.mubr.f32.mxu0 %v3362_v45 }
 0x413   :  { %2922 = vmatmul.mubr.f32.gmra.mrb[28].mxu0 %v3362_v45  ;;  %s3146_s4 = spop %3145 }
 0x414   :  { %v2008_v13 = vstv %s3146_s4  ;;  %2924 = vmatprep.mubr.f32.mxu0 %v3362_v45 }
 0x415   :  { %2010 = vst.msk [vmem:[#allocation13] sm:$0x1] %vm2009_vm9, %v2008_v13 }
 0x417   :  { %2925 = vmatmul.mubr.f32.gmra.mrb[30].mxu0 %v3362_v45 }
 0x4ae   :  { %v2881_v15 = vpop.f32.mrb[0].mxu0 }
 0x4af   :  { %v1712_v17 = vpop.f32.mrb[1].mxu0 }
 0x4b0   :  { %2966 = vmatprep.mubr.f32.mxu0 %v1712_v17 }
 0x4b1   :  { %2967 = vmatmul.mubr.f32.vlgmr.msra.gmra.mrb[32].mxu0 %v2881_v15 }
 0x4b2   :  { %v2884_v18 = vpop.f32.mrb[2].mxu0 }
 0x4b3   :  { %v1722_v19 = vpop.f32.mrb[3].mxu0 }
 0x4b4   :  { %2969 = vmatprep.mubr.f32.mxu0 %v1722_v19 }
 0x4b5   :  { %2970 = vmatmul.mubr.f32.gmra.mrb[34].mxu0 %v2884_v18 }
 0x4b6   :  { %v2887_v20 = vpop.f32.mrb[4].mxu0  ;;  %v2116_v48 = vpop.f32.mrb[64].mxu1 }
 0x4b7   :  { %v1732_v22 = vpop.f32.mrb[5].mxu0  ;;  %v3147_v49 = vtrunc.f32 %v2116_v48  ;;  %v2933_v50 = vpop.f32.mrb[65].mxu1 }
 0x4b8   :  { %2972 = vmatprep.mubr.f32.mxu0 %v1732_v22 }
 0x4b9   :  { %2973 = vmatmul.mubr.f32.gmra.mrb[36].mxu0 %v2887_v20  ;;  %v3148_v54 = vcvt.f32.s32 %v3147_v49 }
 0x4ba   :  { %v2890_v16 = vpop.f32.mrb[6].mxu0 }
 0x4bb   :  { %v1742_v24 = vpop.f32.mrb[7].mxu0  ;;  %v2123_v57 = vcombine.low %v3148_v54, %v3366_v56 }
 0x4bc   :  { %2975 = vmatprep.mubr.f32.mxu0 %v1742_v24 }
 0x4bd   :  { %2976 = vmatmul.mubr.f32.gmra.mrb[38].mxu0 %v2890_v16  ;;  %v2130_v59 = vrot.slane %v2123_v57, %v2129_v58 }
 0x4be   :  { %v2893_v23 = vpop.f32.mrb[8].mxu0 }
 0x4bf   :  { %v1752_v25 = vpop.f32.mrb[9].mxu0  ;;  %v2137_v60 = vrot.slane %v2130_v59, %v2129_v58 }
 0x4c0   :  { %2978 = vmatprep.mubr.f32.mxu0 %v1752_v25 }
 0x4c1   :  { %2979 = vmatmul.mubr.f32.gmra.mrb[40].mxu0 %v2893_v23  ;;  %2142 = vst.msk [vmem:[#allocation11] sm:$0x3] %vm2140_vm11, %v2137_v60 }
 0x4c2   :  { %v2896_v26 = vpop.f32.mrb[10].mxu0 }
 0x4c3   :  { %v1762_v27 = vpop.f32.mrb[11].mxu0 }
 0x4c4   :  { %2981 = vmatprep.mubr.f32.mxu0 %v1762_v27 }
 0x4c5   :  { %2982 = vmatmul.mubr.f32.gmra.mrb[42].mxu0 %v2896_v26 }
 0x4c6   :  { %v2899_v28 = vpop.f32.mrb[12].mxu0 }
 0x4c7   :  { %v1772_v29 = vpop.f32.mrb[13].mxu0 }
 0x4c8   :  { %2984 = vmatprep.mubr.f32.mxu0 %v1772_v29 }
 0x4c9   :  { %2985 = vmatmul.mubr.f32.gmra.mrb[44].mxu0 %v2899_v28 }
 0x4ca   :  { %v2902_v30 = vpop.f32.mrb[14].mxu0 }
 0x4cb   :  { %v1782_v31 = vpop.f32.mrb[15].mxu0 }
 0x4cc   :  { %2987 = vmatprep.mubr.f32.mxu0 %v1782_v31 }
 0x4cd   :  { %2988 = vmatmul.mubr.f32.gmra.mrb[46].mxu0 %v2902_v30 }
 0x4ce   :  { %v2905_v32 = vpop.f32.mrb[16].mxu0 }
 0x4cf   :  { %v1792_v33 = vpop.f32.mrb[17].mxu0 }
 0x4d0   :  { %2990 = vmatprep.mubr.f32.mxu0 %v1792_v33 }
 0x4d1   :  { %2991 = vmatmul.mubr.f32.gmra.mrb[48].mxu0 %v2905_v32 }
 0x4d2   :  { %v2908_v34 = vpop.f32.mrb[18].mxu0 }
 0x4d3   :  { %v1802_v35 = vpop.f32.mrb[19].mxu0 }
 0x4d4   :  { %2993 = vmatprep.mubr.f32.mxu0 %v1802_v35 }
 0x4d5   :  { %2994 = vmatmul.mubr.f32.gmra.mrb[50].mxu0 %v2908_v34 }
 0x4d6   :  { %v2911_v36 = vpop.f32.mrb[20].mxu0 }
 0x4d7   :  { %v1812_v37 = vpop.f32.mrb[21].mxu0 }
 0x4d8   :  { %2996 = vmatprep.mubr.f32.mxu0 %v1812_v37 }
 0x4d9   :  { %2997 = vmatmul.mubr.f32.gmra.mrb[52].mxu0 %v2911_v36 }
 0x4da   :  { %v2914_v38 = vpop.f32.mrb[22].mxu0 }
 0x4db   :  { %v1822_v39 = vpop.f32.mrb[23].mxu0 }
 0x4dc   :  { %2999 = vmatprep.mubr.f32.mxu0 %v1822_v39 }
 0x4dd   :  { %3000 = vmatmul.mubr.f32.gmra.mrb[54].mxu0 %v2914_v38 }
 0x4de   :  { %v2917_v40 = vpop.f32.mrb[24].mxu0 }
 0x4df   :  { %v1832_v41 = vpop.f32.mrb[25].mxu0 }
 0x4e0   :  { %3002 = vmatprep.mubr.f32.mxu0 %v1832_v41 }
 0x4e1   :  { %3003 = vmatmul.mubr.f32.gmra.mrb[56].mxu0 %v2917_v40 }
 0x4e2   :  { %v2920_v42 = vpop.f32.mrb[26].mxu0 }
 0x4e3   :  { %v1842_v43 = vpop.f32.mrb[27].mxu0 }
 0x4e4   :  { %3005 = vmatprep.mubr.f32.mxu0 %v1842_v43 }
 0x4e5   :  { %3006 = vmatmul.mubr.f32.gmra.mrb[58].mxu0 %v2920_v42 }
 0x4e6   :  { %v2923_v44 = vpop.f32.mrb[28].mxu0 }
 0x4e7   :  { %v1852_v45 = vpop.f32.mrb[29].mxu0 }
 0x4e8   :  { %3008 = vmatprep.mubr.f32.mxu0 %v1852_v45 }
 0x4e9   :  { %3009 = vmatmul.mubr.f32.gmra.mrb[60].mxu0 %v2923_v44 }
 0x4ea   :  { %v2926_v46 = vpop.f32.mrb[30].mxu0 }
 0x4eb   :  { %v1862_v47 = vpop.f32.mrb[31].mxu0 }
 0x4ec   :  { %3011 = vmatprep.mubr.f32.mxu0 %v1862_v47 }
 0x4ed   :  { %3012 = vmatmul.mubr.f32.gmra.mrb[62].mxu0 %v2926_v46 }
 0x4ee   :  { %3265 = shalt.err (!%p3262_p8)
}
 0x4ef   :  { %s3266_s11 = scalar_lea.hbm %s3728_s8, 32 }
 0x4f0   :  { %p3267_p9 = scmp.ne.s32.totalorder %s3728_s8, %s3266_s11  ;;  %p3270_p10 = scmp.lt.u32.totalorder %s3266_s11, %s3728_s8 }
 0x4f2   :  { %p3272_p11 = pnand %p3270_p10, %p3267_p9 }
 0x4f4   :  { %3275 = shalt.err (!%p3272_p11)
}
 0x4f5   :  { %2444 = dma.vmem_to_hbm [thread:$0]  %s2442_s27, 32, %s3728_s8, [#allocation12]  }
 0x4f6   :  { %s3368_s18 = smov [#allocation13]   ;;  %s3369_s14 = smov [#allocation14]  }
 0x4f7   :  { %s2451_s1 = sshll.u32 %s3368_s18, 4  ;;  %s2461_s19 = sshll.u32 %s3369_s14, 4  ;;  %s2452_s1 = int_to_ptr.vmem [resolvable:$true] %s2451_s1  ;;  %s2462_s19 = int_to_ptr.vmem [resolvable:$true] %s2461_s19 }
 0x4f8   :  { %s3276_s21 = scalar_lea.vmem %s2452_s1, 16  ;;  %s3280_s3 = scalar_lea.vmem %s2452_s1, 32 }
 0x4f9   :  { %p3277_p12 = scmp.ne.s32.totalorder %s2452_s1, %s3276_s21  ;;  %p3281_p13 = scmp.lt.s32.totalorder %s2452_s1, %s2452_s1 }
 0x4fa   :  { %p3282_p0 = scmp.lt.s32.totalorder %s3280_s3, %s3276_s21 }
 0x4fc   :  { %p3283_p1 = por %p3282_p0, %p3281_p13 }
 0x4fe   :  { %p3284_p2 = pnand %p3283_p1, %p3277_p12 }
 0x500   :  { %3287 = shalt.err (!%p3284_p2)
}
 0x501   :  { %s3288_s22 = scalar_lea.hbm %s3729_s9, 16 }
 0x502   :  { %p3289_p3 = scmp.ne.s32.totalorder %s3729_s9, %s3288_s22  ;;  %p3292_p4 = scmp.lt.u32.totalorder %s3288_s22, %s3729_s9 }
 0x504   :  { %p3294_p5 = pnand %p3292_p4, %p3289_p3 }
 0x506   :  { %3297 = shalt.err (!%p3294_p5)
}
 0x507   :  { %2454 = dma.vmem_to_hbm [thread:$0]  %s2452_s1, 16, %s3729_s9, [#allocation12]  }
 0x508   :  { %s3298_s28 = scalar_lea.vmem %s2462_s19, 16  ;;  %s3302_s29 = scalar_lea.vmem %s2462_s19, 32 }
 0x509   :  { %p3299_p6 = scmp.ne.s32.totalorder %s2462_s19, %s3298_s28  ;;  %p3303_p7 = scmp.lt.s32.totalorder %s2462_s19, %s2462_s19 }
 0x50a   :  { %p3304_p8 = scmp.lt.s32.totalorder %s3302_s29, %s3298_s28 }
 0x50c   :  { %p3305_p9 = por %p3304_p8, %p3303_p7 }
 0x50e   :  { %p3306_p10 = pnand %p3305_p9, %p3299_p6 }
 0x510   :  { %3309 = shalt.err (!%p3306_p10)
}
 0x511   :  { %s3310_s0 = scalar_lea.hbm %s3730_s10, 16 }
 0x512   :  { %p3311_p11 = scmp.ne.s32.totalorder %s3730_s10, %s3310_s0  ;;  %p3314_p12 = scmp.lt.u32.totalorder %s3310_s0, %s3730_s10 }
 0x514   :  { %p3316_p13 = pnand %p3314_p12, %p3311_p11 }
 0x516   :  { %3319 = shalt.err (!%p3316_p13)
}
 0x517   :  { %2464 = dma.vmem_to_hbm [thread:$0]  %s2462_s19, 16, %s3730_s10, [#allocation15]   ;;  %v3671_v21 = vld [vmem:[%s3726_s6] ss:$0 sm:$0xff] }
 0x518   :  { %s3370_s6 = smov [#allocation10]  }
 0x519   :  { %s2428_s10 = sshll.u32 %s3370_s6, 4  ;;  %s2429_s10 = int_to_ptr.vmem [resolvable:$true] %s2428_s10 }
 0x51a   :  { %s3320_s14 = scalar_lea.vmem %s2429_s10, 4096  ;;  %p3325_p1 = scmp.lt.s32.totalorder %s2429_s10, %s2429_s10 }
 0x51b   :  { %p3321_p0 = scmp.ne.s32.totalorder %s2429_s10, %s3320_s14  ;;  %p3326_p2 = scmp.lt.s32.totalorder %s3320_s14, %s3320_s14 }
 0x51d   :  { %p3327_p3 = por %p3326_p2, %p3325_p1 }
 0x51f   :  { %p3328_p4 = pnand %p3327_p3, %p3321_p0 }
 0x584   :  { %v2968_v61 = vpop.f32.mrb[32].mxu0 }
 0x585   :  { %v2238_v62 = vadd.f32 %v2968_v61, %v3671_v21  ;;  %v2232_v63 = vpop.f32.mrb[33].mxu0 }
 0x586   :  { %v2233_v0 = vadd.f32 %v3671_v21, %v2232_v63 }
 0x587   :  { %2392 = vst [vmem:[#allocation10 + $0x8] sm:$0xff] %v2238_v62 }
 0x588   :  { %2391 = vst [vmem:[#allocation10] sm:$0xff] %v2233_v0  ;;  %v2971_v1 = vpop.f32.mrb[34].mxu0 }
 0x589   :  { %v2248_v2 = vadd.f32 %v2971_v1, %v3671_v21  ;;  %v2242_v3 = vpop.f32.mrb[35].mxu0 }
 0x58a   :  { %v2243_v4 = vadd.f32 %v3671_v21, %v2242_v3 }
 0x58b   :  { %2394 = vst [vmem:[#allocation10 + $0x18] sm:$0xff] %v2248_v2 }
 0x58c   :  { %2393 = vst [vmem:[#allocation10 + $0x10] sm:$0xff] %v2243_v4  ;;  %v2974_v5 = vpop.f32.mrb[36].mxu0 }
 0x58d   :  { %v2258_v6 = vadd.f32 %v2974_v5, %v3671_v21  ;;  %v2252_v7 = vpop.f32.mrb[37].mxu0 }
 0x58e   :  { %v2253_v8 = vadd.f32 %v3671_v21, %v2252_v7 }
 0x58f   :  { %2396 = vst [vmem:[#allocation10 + $0x28] sm:$0xff] %v2258_v6 }
 0x590   :  { %2395 = vst [vmem:[#allocation10 + $0x20] sm:$0xff] %v2253_v8  ;;  %v2977_v9 = vpop.f32.mrb[38].mxu0 }
 0x591   :  { %v2268_v10 = vadd.f32 %v2977_v9, %v3671_v21  ;;  %v2262_v11 = vpop.f32.mrb[39].mxu0 }
 0x592   :  { %v2263_v12 = vadd.f32 %v3671_v21, %v2262_v11 }
 0x593   :  { %2398 = vst [vmem:[#allocation10 + $0x38] sm:$0xff] %v2268_v10 }
 0x594   :  { %2397 = vst [vmem:[#allocation10 + $0x30] sm:$0xff] %v2263_v12  ;;  %v2980_v13 = vpop.f32.mrb[40].mxu0 }
 0x595   :  { %v2278_v14 = vadd.f32 %v2980_v13, %v3671_v21  ;;  %v2272_v15 = vpop.f32.mrb[41].mxu0 }
 0x596   :  { %v2273_v17 = vadd.f32 %v3671_v21, %v2272_v15 }
 0x597   :  { %2400 = vst [vmem:[#allocation10 + $0x48] sm:$0xff] %v2278_v14 }
 0x598   :  { %2399 = vst [vmem:[#allocation10 + $0x40] sm:$0xff] %v2273_v17  ;;  %v2983_v18 = vpop.f32.mrb[42].mxu0 }
 0x599   :  { %v2288_v19 = vadd.f32 %v2983_v18, %v3671_v21  ;;  %v2282_v20 = vpop.f32.mrb[43].mxu0 }
 0x59a   :  { %v2283_v22 = vadd.f32 %v3671_v21, %v2282_v20 }
 0x59b   :  { %2402 = vst [vmem:[#allocation10 + $0x58] sm:$0xff] %v2288_v19 }
 0x59c   :  { %2401 = vst [vmem:[#allocation10 + $0x50] sm:$0xff] %v2283_v22  ;;  %v2986_v16 = vpop.f32.mrb[44].mxu0 }
 0x59d   :  { %v2298_v24 = vadd.f32 %v2986_v16, %v3671_v21  ;;  %v2292_v23 = vpop.f32.mrb[45].mxu0 }
 0x59e   :  { %v2293_v25 = vadd.f32 %v3671_v21, %v2292_v23 }
 0x59f   :  { %2404 = vst [vmem:[#allocation10 + $0x68] sm:$0xff] %v2298_v24 }
 0x5a0   :  { %2403 = vst [vmem:[#allocation10 + $0x60] sm:$0xff] %v2293_v25  ;;  %v2989_v26 = vpop.f32.mrb[46].mxu0 }
 0x5a1   :  { %v2308_v27 = vadd.f32 %v2989_v26, %v3671_v21  ;;  %v2302_v28 = vpop.f32.mrb[47].mxu0 }
 0x5a2   :  { %v2303_v29 = vadd.f32 %v3671_v21, %v2302_v28 }
 0x5a3   :  { %2406 = vst [vmem:[#allocation10 + $0x78] sm:$0xff] %v2308_v27 }
 0x5a4   :  { %2405 = vst [vmem:[#allocation10 + $0x70] sm:$0xff] %v2303_v29  ;;  %v2992_v30 = vpop.f32.mrb[48].mxu0 }
 0x5a5   :  { %v2318_v31 = vadd.f32 %v2992_v30, %v3671_v21  ;;  %v2312_v32 = vpop.f32.mrb[49].mxu0 }
 0x5a6   :  { %v2313_v33 = vadd.f32 %v3671_v21, %v2312_v32 }
 0x5a7   :  { %2408 = vst [vmem:[#allocation10 + $0x88] sm:$0xff] %v2318_v31 }
 0x5a8   :  { %2407 = vst [vmem:[#allocation10 + $0x80] sm:$0xff] %v2313_v33  ;;  %v2995_v34 = vpop.f32.mrb[50].mxu0 }
 0x5a9   :  { %v2328_v35 = vadd.f32 %v2995_v34, %v3671_v21  ;;  %v2322_v36 = vpop.f32.mrb[51].mxu0 }
 0x5aa   :  { %v2323_v37 = vadd.f32 %v3671_v21, %v2322_v36 }
 0x5ab   :  { %2410 = vst [vmem:[#allocation10 + $0x98] sm:$0xff] %v2328_v35 }
 0x5ac   :  { %2409 = vst [vmem:[#allocation10 + $0x90] sm:$0xff] %v2323_v37  ;;  %v2998_v38 = vpop.f32.mrb[52].mxu0 }
 0x5ad   :  { %v2338_v39 = vadd.f32 %v2998_v38, %v3671_v21  ;;  %v2332_v40 = vpop.f32.mrb[53].mxu0 }
 0x5ae   :  { %v2333_v41 = vadd.f32 %v3671_v21, %v2332_v40 }
 0x5af   :  { %2412 = vst [vmem:[#allocation10 + $0xa8] sm:$0xff] %v2338_v39 }
 0x5b0   :  { %2411 = vst [vmem:[#allocation10 + $0xa0] sm:$0xff] %v2333_v41  ;;  %v3001_v42 = vpop.f32.mrb[54].mxu0 }
 0x5b1   :  { %v2348_v43 = vadd.f32 %v3001_v42, %v3671_v21  ;;  %v2342_v44 = vpop.f32.mrb[55].mxu0 }
 0x5b2   :  { %v2343_v45 = vadd.f32 %v3671_v21, %v2342_v44 }
 0x5b3   :  { %2414 = vst [vmem:[#allocation10 + $0xb8] sm:$0xff] %v2348_v43 }
 0x5b4   :  { %2413 = vst [vmem:[#allocation10 + $0xb0] sm:$0xff] %v2343_v45  ;;  %v3004_v46 = vpop.f32.mrb[56].mxu0 }
 0x5b5   :  { %v2358_v47 = vadd.f32 %v3004_v46, %v3671_v21  ;;  %v2352_v48 = vpop.f32.mrb[57].mxu0 }
 0x5b6   :  { %v2353_v49 = vadd.f32 %v3671_v21, %v2352_v48 }
 0x5b7   :  { %2416 = vst [vmem:[#allocation10 + $0xc8] sm:$0xff] %v2358_v47 }
 0x5b8   :  { %2415 = vst [vmem:[#allocation10 + $0xc0] sm:$0xff] %v2353_v49  ;;  %v3007_v50 = vpop.f32.mrb[58].mxu0 }
 0x5b9   :  { %v2368_v51 = vadd.f32 %v3007_v50, %v3671_v21  ;;  %v2362_v52 = vpop.f32.mrb[59].mxu0 }
 0x5ba   :  { %v2363_v53 = vadd.f32 %v3671_v21, %v2362_v52 }
 0x5bb   :  { %2418 = vst [vmem:[#allocation10 + $0xd8] sm:$0xff] %v2368_v51 }
 0x5bc   :  { %2417 = vst [vmem:[#allocation10 + $0xd0] sm:$0xff] %v2363_v53  ;;  %v3010_v54 = vpop.f32.mrb[60].mxu0 }
 0x5bd   :  { %v2378_v55 = vadd.f32 %v3010_v54, %v3671_v21  ;;  %v2372_v56 = vpop.f32.mrb[61].mxu0 }
 0x5be   :  { %v2373_v57 = vadd.f32 %v3671_v21, %v2372_v56 }
 0x5bf   :  { %2420 = vst [vmem:[#allocation10 + $0xe8] sm:$0xff] %v2378_v55 }
 0x5c0   :  { %2419 = vst [vmem:[#allocation10 + $0xe0] sm:$0xff] %v2373_v57  ;;  %v3013_v58 = vpop.f32.mrb[62].mxu0 }
 0x5c1   :  { %v2388_v59 = vadd.f32 %v3013_v58, %v3671_v21  ;;  %v2382_v60 = vpop.f32.mrb[63].mxu0 }
 0x5c2   :  { %v2383_v61 = vadd.f32 %v3671_v21, %v2382_v60 }
 0x5c3   :  { %2422 = vst [vmem:[#allocation10 + $0xf8] sm:$0xff] %v2388_v59 }
 0x5c4   :  { %2421 = vst [vmem:[#allocation10 + $0xf0] sm:$0xff] %v2383_v61 }
 0x5c5   :  { %3331 = shalt.err (!%p3328_p4)
}
 0x5c6   :  { %s3332_s3 = scalar_lea.hbm %s3727_s7, 4096 }
 0x5c7   :  { %p3333_p5 = scmp.ne.s32.totalorder %s3727_s7, %s3332_s3  ;;  %p3336_p6 = scmp.lt.u32.totalorder %s3332_s3, %s3727_s7 }
 0x5c9   :  { %p3338_p7 = pnand %p3336_p6, %p3333_p5 }
 0x5cb   :  { %3341 = shalt.err (!%p3338_p7)
}
 0x5cc   :  { %2434 = dma.vmem_to_hbm [thread:$0]  %s2429_s10, 4096, %s3727_s7, [#allocation4], %s3356_s25, %s3356_s25, %s3357_s26  }
 0x5cd   :  { %3348 = dma.done.wait [#allocation4], 4096  }
 0x5ce   :  { %3349 = vsyncadd [#allocation4], 4294963200 }
 0x5cf   :  { %3350 = dma.done.wait [#allocation12], 48  }
 0x5d0   :  { %3351 = vsyncadd [#allocation12], 4294967248 }
 0x5d1   :  { %3352 = dma.done.wait [#allocation15], 16  }
 0x5d2   :  { %3353 = vsyncadd [#allocation15], 4294967280 }
 0x5d3   :  { %2477 = vsyncpa [#allocation3], 1 }
 0x5d4   :  { %2478 = vsyncpa [#allocation6], 1 }
 0x5d5   :  { %2479 = vsyncpa [#allocation9], 1 }
 0x5d6   :  { %2480 = vsyncpa [#allocation4], 1 }
 0x5d7   :  { %2481 = vsyncpa [#allocation12], 1 }
 0x5d8   :  { %2482 = vsyncpa [#allocation15], 1 }

</bundles_post_ra>
